<compile_context>
chip_gen: v6e
topology: v6e:2x2x1
jax: 0.10.0
libtpu: 0.0.40
codegen_flags: <defaults>
</compile_context>

<pallas_src>
import functools

import jax
import jax.numpy as jnp
from jax.experimental import pallas as pl
from jax.experimental.pallas import tpu as pltpu


LATENT_DIM = 16
IMG_SHAPE = (1, 8, 8)          # small MNIST-like image
IMG_PROD = 1 * 8 * 8           # 64
OUT_PAD = 128                  # head out-features padded to a lane multiple
HIDDEN = (128, 256, 512, 1024)
BN_EPS = 0.8                   # nn.BatchNorm1d(out_feat, 0.8) -> eps = 0.8
LRELU_SLOPE = 0.2

# Packed per-feature vector layout (all offsets are multiples of 128 so the
# static lane slices never cross an (8,128) tile boundary).
_OFF_B1 = 0
_OFF_G2 = _OFF_B1 + HIDDEN[0]          # 128
_OFF_BE2 = _OFF_G2 + HIDDEN[1]         # 384
_OFF_G3 = _OFF_BE2 + HIDDEN[1]         # 640
_OFF_BE3 = _OFF_G3 + HIDDEN[2]         # 1152
_OFF_G4 = _OFF_BE3 + HIDDEN[2]         # 1664
_OFF_BE4 = _OFF_G4 + HIDDEN[3]         # 2688
_OFF_B5 = _OFF_BE4 + HIDDEN[3]         # 3712
VEC_TOTAL = _OFF_B5 + OUT_PAD          # 3840


def _leaky_relu(x, slope=LRELU_SLOPE):
    # mul + max instead of compare + select: one fewer VALU op, no mask vreg.
    return jnp.maximum(x, slope * x)


def _dot_bf16(x_f32, w_bf16):
    # bf16 x bf16 -> f32 accumulate on the MXU.
    return jnp.dot(
        x_f32.astype(jnp.bfloat16), w_bf16,
        preferred_element_type=jnp.float32,
    )


def _bn_affine_lrelu(h, gamma, beta, eps=BN_EPS):
    """Train-mode BatchNorm1d (biased batch stats) folded into one affine,
    followed by LeakyReLU.  The preceding linear bias cancels exactly under
    batch statistics and is therefore omitted upstream.  One-pass variance:
    E[h^2] - mu^2 (clamped at 0)."""
    mu = jnp.mean(h, axis=0, keepdims=True)                        # (1, F)
    var = jnp.maximum(jnp.mean(h * h, axis=0, keepdims=True) - mu * mu, 0.0)
    scale = gamma * jax.lax.rsqrt(var + eps)                       # (1, F)
    shift = beta - mu * scale                                      # (1, F)
    return _leaky_relu(h * scale + shift)


def generator_kernel(z_ref, w1_ref, vec_ref,
                     w2_hbm, w3_hbm, w4_hbm, w5_hbm,
                     out_ref,
                     w2_buf, w3_buf, w4_buf, w5_buf, sem):
    # Issue all weight DMAs up front (HBM -> VMEM scratch); they complete in
    # issue order while blocks 1..k compute, and we only wait right before
    # each weight's matmul.
    cp2 = pltpu.make_async_copy(w2_hbm, w2_buf, sem.at[0])
    cp3 = pltpu.make_async_copy(w3_hbm, w3_buf, sem.at[1])
    cp4 = pltpu.make_async_copy(w4_hbm, w4_buf, sem.at[2])
    cp5 = pltpu.make_async_copy(w5_hbm, w5_buf, sem.at[3])
    cp2.start()
    cp3.start()
    cp4.start()
    cp5.start()

    # Unpack the per-feature vectors (static, lane-aligned slices).
    b1 = vec_ref[:, _OFF_B1:_OFF_B1 + HIDDEN[0]]
    g2 = vec_ref[:, _OFF_G2:_OFF_G2 + HIDDEN[1]]
    be2 = vec_ref[:, _OFF_BE2:_OFF_BE2 + HIDDEN[1]]
    g3 = vec_ref[:, _OFF_G3:_OFF_G3 + HIDDEN[2]]
    be3 = vec_ref[:, _OFF_BE3:_OFF_BE3 + HIDDEN[2]]
    g4 = vec_ref[:, _OFF_G4:_OFF_G4 + HIDDEN[3]]
    be4 = vec_ref[:, _OFF_BE4:_OFF_BE4 + HIDDEN[3]]
    b5 = vec_ref[:, _OFF_B5:_OFF_B5 + OUT_PAD]

    # block 1: Linear(latent, 128) + LeakyReLU (no BN); overlaps w2..w5 DMAs.
    h = _leaky_relu(_dot_bf16(z_ref[...], w1_ref[...]) + b1)

    # block 2: Linear(128, 256) + BN + LeakyReLU  (linear bias cancels in BN)
    cp2.wait()
    h = _bn_affine_lrelu(_dot_bf16(h, w2_buf[...]), g2, be2)

    # block 3: Linear(256, 512) + BN + LeakyReLU
    cp3.wait()
    h = _bn_affine_lrelu(_dot_bf16(h, w3_buf[...]), g3, be3)

    # block 4: Linear(512, 1024) + BN + LeakyReLU
    cp4.wait()
    h = _bn_affine_lrelu(_dot_bf16(h, w4_buf[...]), g4, be4)

    # head: Linear(1024, prod(img_shape) padded to 128) + Tanh (lane-dense)
    cp5.wait()
    out_ref[...] = jnp.tanh(_dot_bf16(h, w5_buf[...]) + b5)


def init_params(key, latent_dim=LATENT_DIM, img_prod=IMG_PROD, hidden=HIDDEN):
    """Deterministic synthetic init: weights ~ N(0, 0.02) stored (in, out) in
    bf16, biases 0, BN gamma=1 / beta=0.  The head weight is zero-padded on
    out-features to OUT_PAD for lane-dense stores.  All tiny per-feature
    vectors are packed into one (1, VEC_TOTAL) f32 array."""
    dims = (latent_dim,) + hidden + (img_prod,)
    keys = jax.random.split(key, len(dims) - 1)

    params = {}
    for i in range(len(dims) - 1):
        fin, fout = dims[i], dims[i + 1]
        w = 0.02 * jax.random.normal(keys[i], (fin, fout), dtype=jnp.float32)
        if i == len(dims) - 2:  # head: pad out-features 64 -> 128
            w = jnp.pad(w, ((0, 0), (0, OUT_PAD - fout)))
        params[f"w{i + 1}"] = w.astype(jnp.bfloat16)

    # Packed per-feature vector: [b1 | g2 | be2 | g3 | be3 | g4 | be4 | b5_pad]
    # Linear biases for BN blocks (b2..b4) are omitted: they cancel exactly
    # under train-mode batch statistics.
    vec = jnp.concatenate([
        jnp.zeros((hidden[0],), jnp.float32),   # b1
        jnp.ones((hidden[1],), jnp.float32),    # g2
        jnp.zeros((hidden[1],), jnp.float32),   # be2
        jnp.ones((hidden[2],), jnp.float32),    # g3
        jnp.zeros((hidden[2],), jnp.float32),   # be3
        jnp.ones((hidden[3],), jnp.float32),    # g4
        jnp.zeros((hidden[3],), jnp.float32),   # be4
        jnp.zeros((OUT_PAD,), jnp.float32),     # b5 (padded)
    ]).reshape(1, VEC_TOTAL)
    params["vec"] = vec
    return params


def _cost_estimate(batch):
    dims = (LATENT_DIM,) + HIDDEN + (OUT_PAD,)
    kn = sum(dims[i] * dims[i + 1] for i in range(len(dims) - 1))   # sum K*N
    flops = 2 * batch * kn
    # tanh on the head output + rsqrt for 3 BN blocks (per-feature)
    transcendentals = batch * OUT_PAD + sum(HIDDEN[1:])
    bytes_accessed = (
        2 * kn                           # bf16 weights
        + 4 * VEC_TOTAL                  # packed per-feature vector (f32)
        + 4 * batch * LATENT_DIM         # z
        + 4 * batch * OUT_PAD            # output
    )
    return pl.CostEstimate(flops=flops,
                           transcendentals=transcendentals,
                           bytes_accessed=bytes_accessed)


@functools.partial(jax.jit, static_argnames=("img_shape",))
def generator_forward(z, params, img_shape=IMG_SHAPE):
    B = z.shape[0]
    img_prod = 1
    for d in img_shape:
        img_prod *= d

    args = (
        z, params["w1"], params["vec"],                     # VMEM inputs
        params["w2"], params["w3"], params["w4"], params["w5"],  # HBM inputs
    )

    vmem_spec = pl.BlockSpec(memory_space=pltpu.MemorySpace.VMEM)
    hbm_spec = pl.BlockSpec(memory_space=pl.ANY)

    out_padded = pl.pallas_call(
        generator_kernel,
        out_shape=jax.ShapeDtypeStruct((B, OUT_PAD), jnp.float32),
        in_specs=[vmem_spec, vmem_spec, vmem_spec,
                  hbm_spec, hbm_spec, hbm_spec, hbm_spec],
        out_specs=vmem_spec,
        scratch_shapes=[
            pltpu.VMEM((HIDDEN[0], HIDDEN[1]), jnp.bfloat16),   # w2 buffer
            pltpu.VMEM((HIDDEN[1], HIDDEN[2]), jnp.bfloat16),   # w3 buffer
            pltpu.VMEM((HIDDEN[2], HIDDEN[3]), jnp.bfloat16),   # w4 buffer
            pltpu.VMEM((HIDDEN[3], OUT_PAD), jnp.bfloat16),     # w5 buffer
            pltpu.SemaphoreType.DMA((4,)),
        ],
        compiler_params=pltpu.CompilerParams(vmem_limit_bytes=16 << 20),
        cost_estimate=_cost_estimate(B),
    )(*args)

    # glue: drop lane padding, reshape (B, prod) -> (B, *img_shape) (NCHW)
    return out_padded[:, :img_prod].reshape((B,) + tuple(img_shape))


if __name__ == "__main__":
    key = jax.random.PRNGKey(0)
    kp, kz = jax.random.split(key)

    params = init_params(kp)

    B = 8
    z = jax.random.normal(kz, (B, LATENT_DIM), dtype=jnp.float32)

    img = generator_forward(z, params, IMG_SHAPE)
    img = jax.block_until_ready(img)

    assert img.shape == (B,) + IMG_SHAPE, img.shape
    assert img.dtype == jnp.float32
    assert bool(jnp.all(jnp.isfinite(img)))
    # tanh output range sanity
    assert bool(jnp.all(jnp.abs(img) <= 1.0 + 1e-6))

    print("KERNEL_OK")
</pallas_src>

<mosaic_0001>
module attributes {stable_mosaic.version = 11 : i64} {
  func.func @generator_kernel(%arg0: memref<8x16xf32, #tpu.memory_space<vmem>>, %arg1: memref<16x128xbf16, #tpu.memory_space<vmem>>, %arg2: memref<1x3840xf32, #tpu.memory_space<vmem>>, %arg3: memref<128x256xbf16, #tpu.memory_space<any>>, %arg4: memref<256x512xbf16, #tpu.memory_space<any>>, %arg5: memref<512x1024xbf16, #tpu.memory_space<any>>, %arg6: memref<1024x128xbf16, #tpu.memory_space<any>>, %arg7: memref<8x128xf32, #tpu.memory_space<vmem>>, %arg8: memref<128x256xbf16, #tpu.memory_space<vmem>>, %arg9: memref<256x512xbf16, #tpu.memory_space<vmem>>, %arg10: memref<512x1024xbf16, #tpu.memory_space<vmem>>, %arg11: memref<1024x128xbf16, #tpu.memory_space<vmem>>, %arg12: memref<4x!tpu.dma_semaphore, #tpu.memory_space<semaphore_mem>>) attributes {dimension_semantics = [], scalar_prefetch = 0 : i64, scratch_operands = 5 : i64, tpu.core_type = #tpu.core_type<tc>} {
    %c0_i32 = arith.constant 0 : i32
    %0 = tpu.memref_slice %arg12[%c0_i32] : memref<4x!tpu.dma_semaphore, #tpu.memory_space<semaphore_mem>> -> memref<1x!tpu.dma_semaphore, #tpu.memory_space<semaphore_mem>>
    %1 = tpu.memref_squeeze %0 : memref<1x!tpu.dma_semaphore, #tpu.memory_space<semaphore_mem>> -> memref<!tpu.dma_semaphore, #tpu.memory_space<semaphore_mem>>
    tpu.enqueue_dma source(%arg3 : memref<128x256xbf16, #tpu.memory_space<any>>) target(%arg8 : memref<128x256xbf16, #tpu.memory_space<vmem>>) target_semaphore(%1 : memref<!tpu.dma_semaphore, #tpu.memory_space<semaphore_mem>>)
    %c1_i32 = arith.constant 1 : i32
    %2 = tpu.memref_slice %arg12[%c1_i32] : memref<4x!tpu.dma_semaphore, #tpu.memory_space<semaphore_mem>> -> memref<1x!tpu.dma_semaphore, #tpu.memory_space<semaphore_mem>>
    %3 = tpu.memref_squeeze %2 : memref<1x!tpu.dma_semaphore, #tpu.memory_space<semaphore_mem>> -> memref<!tpu.dma_semaphore, #tpu.memory_space<semaphore_mem>>
    tpu.enqueue_dma source(%arg4 : memref<256x512xbf16, #tpu.memory_space<any>>) target(%arg9 : memref<256x512xbf16, #tpu.memory_space<vmem>>) target_semaphore(%3 : memref<!tpu.dma_semaphore, #tpu.memory_space<semaphore_mem>>)
    %c2_i32 = arith.constant 2 : i32
    %4 = tpu.memref_slice %arg12[%c2_i32] : memref<4x!tpu.dma_semaphore, #tpu.memory_space<semaphore_mem>> -> memref<1x!tpu.dma_semaphore, #tpu.memory_space<semaphore_mem>>
    %5 = tpu.memref_squeeze %4 : memref<1x!tpu.dma_semaphore, #tpu.memory_space<semaphore_mem>> -> memref<!tpu.dma_semaphore, #tpu.memory_space<semaphore_mem>>
    tpu.enqueue_dma source(%arg5 : memref<512x1024xbf16, #tpu.memory_space<any>>) target(%arg10 : memref<512x1024xbf16, #tpu.memory_space<vmem>>) target_semaphore(%5 : memref<!tpu.dma_semaphore, #tpu.memory_space<semaphore_mem>>)
    %c3_i32 = arith.constant 3 : i32
    %6 = tpu.memref_slice %arg12[%c3_i32] : memref<4x!tpu.dma_semaphore, #tpu.memory_space<semaphore_mem>> -> memref<1x!tpu.dma_semaphore, #tpu.memory_space<semaphore_mem>>
    %7 = tpu.memref_squeeze %6 : memref<1x!tpu.dma_semaphore, #tpu.memory_space<semaphore_mem>> -> memref<!tpu.dma_semaphore, #tpu.memory_space<semaphore_mem>>
    tpu.enqueue_dma source(%arg6 : memref<1024x128xbf16, #tpu.memory_space<any>>) target(%arg11 : memref<1024x128xbf16, #tpu.memory_space<vmem>>) target_semaphore(%7 : memref<!tpu.dma_semaphore, #tpu.memory_space<semaphore_mem>>)
    %c0 = arith.constant 0 : index
    %c0_0 = arith.constant 0 : index
    %8 = vector.load %arg2[%c0, %c0_0] : memref<1x3840xf32, #tpu.memory_space<vmem>>, vector<1x128xf32>
    %c0_1 = arith.constant 0 : index
    %c128 = arith.constant 128 : index
    %9 = vector.load %arg2[%c0_1, %c128] : memref<1x3840xf32, #tpu.memory_space<vmem>>, vector<1x256xf32>
    %c0_2 = arith.constant 0 : index
    %c384 = arith.constant 384 : index
    %10 = vector.load %arg2[%c0_2, %c384] : memref<1x3840xf32, #tpu.memory_space<vmem>>, vector<1x256xf32>
    %c0_3 = arith.constant 0 : index
    %c640 = arith.constant 640 : index
    %11 = vector.load %arg2[%c0_3, %c640] : memref<1x3840xf32, #tpu.memory_space<vmem>>, vector<1x512xf32>
    %c0_4 = arith.constant 0 : index
    %c1152 = arith.constant 1152 : index
    %12 = vector.load %arg2[%c0_4, %c1152] : memref<1x3840xf32, #tpu.memory_space<vmem>>, vector<1x512xf32>
    %c0_5 = arith.constant 0 : index
    %c1664 = arith.constant 1664 : index
    %13 = vector.load %arg2[%c0_5, %c1664] : memref<1x3840xf32, #tpu.memory_space<vmem>>, vector<1x1024xf32>
    %c0_6 = arith.constant 0 : index
    %c2688 = arith.constant 2688 : index
    %14 = vector.load %arg2[%c0_6, %c2688] : memref<1x3840xf32, #tpu.memory_space<vmem>>, vector<1x1024xf32>
    %c0_7 = arith.constant 0 : index
    %c3712 = arith.constant 3712 : index
    %15 = vector.load %arg2[%c0_7, %c3712] : memref<1x3840xf32, #tpu.memory_space<vmem>>, vector<1x128xf32>
    %c0_8 = arith.constant 0 : index
    %c0_9 = arith.constant 0 : index
    %16 = vector.load %arg0[%c0_8, %c0_9] : memref<8x16xf32, #tpu.memory_space<vmem>>, vector<8x16xf32>
    %c0_10 = arith.constant 0 : index
    %c0_11 = arith.constant 0 : index
    %17 = vector.load %arg1[%c0_10, %c0_11] : memref<16x128xbf16, #tpu.memory_space<vmem>>, vector<16x128xbf16>
    %18 = arith.truncf %16 : vector<8x16xf32> to vector<8x16xbf16>
    %cst = arith.constant dense<0.000000e+00> : vector<8x128xf32>
    %19 = tpu.matmul %18, %17, %cst {dimension_numbers = #tpu.dot_dimension_numbers<[1], [0], [0], [1], [0, 0, 1, 1], [], []>} : vector<8x16xbf16>, vector<16x128xbf16>, vector<8x128xf32> -> vector<8x128xf32>
    %20 = vector.broadcast %8 : vector<1x128xf32> to vector<8x128xf32>
    %21 = arith.addf %19, %20 : vector<8x128xf32>
    %cst_12 = arith.constant 2.000000e-01 : f32
    %22 = vector.broadcast %cst_12 : f32 to vector<8x128xf32>
    %23 = arith.mulf %22, %21 : vector<8x128xf32>
    %24 = arith.maximumf %21, %23 : vector<8x128xf32>
    %c0_i32_13 = arith.constant 0 : i32
    %25 = tpu.memref_slice %arg12[%c0_i32_13] : memref<4x!tpu.dma_semaphore, #tpu.memory_space<semaphore_mem>> -> memref<1x!tpu.dma_semaphore, #tpu.memory_space<semaphore_mem>>
    %26 = tpu.memref_squeeze %25 : memref<1x!tpu.dma_semaphore, #tpu.memory_space<semaphore_mem>> -> memref<!tpu.dma_semaphore, #tpu.memory_space<semaphore_mem>>
    tpu.wait_dma2 semaphore(%26 : memref<!tpu.dma_semaphore, #tpu.memory_space<semaphore_mem>>) src(%arg3 : memref<128x256xbf16, #tpu.memory_space<any>>) dst(%arg8 : memref<128x256xbf16, #tpu.memory_space<vmem>>)
    %c0_14 = arith.constant 0 : index
    %c0_15 = arith.constant 0 : index
    %27 = vector.load %arg8[%c0_14, %c0_15] : memref<128x256xbf16, #tpu.memory_space<vmem>>, vector<128x256xbf16>
    %28 = arith.truncf %24 : vector<8x128xf32> to vector<8x128xbf16>
    %cst_16 = arith.constant dense<0.000000e+00> : vector<8x256xf32>
    %29 = tpu.matmul %28, %27, %cst_16 {dimension_numbers = #tpu.dot_dimension_numbers<[1], [0], [0], [1], [0, 0, 1, 1], [], []>} : vector<8x128xbf16>, vector<128x256xbf16>, vector<8x256xf32> -> vector<8x256xf32>
    %cst_17 = arith.constant dense<0.000000e+00> : vector<256xf32>
    %30 = vector.multi_reduction <add>, %29, %cst_17 [0] : vector<8x256xf32> to vector<256xf32>
    %31 = vector.shape_cast %30 : vector<256xf32> to vector<1x256xf32>
    %cst_18 = arith.constant 8.000000e+00 : f32
    %32 = vector.broadcast %cst_18 : f32 to vector<1x256xf32>
    %33 = arith.divf %31, %32 : vector<1x256xf32>
    %34 = arith.mulf %29, %29 : vector<8x256xf32>
    %cst_19 = arith.constant dense<0.000000e+00> : vector<256xf32>
    %35 = vector.multi_reduction <add>, %34, %cst_19 [0] : vector<8x256xf32> to vector<256xf32>
    %36 = vector.shape_cast %35 : vector<256xf32> to vector<1x256xf32>
    %cst_20 = arith.constant 8.000000e+00 : f32
    %37 = vector.broadcast %cst_20 : f32 to vector<1x256xf32>
    %38 = arith.divf %36, %37 : vector<1x256xf32>
    %39 = arith.mulf %33, %33 : vector<1x256xf32>
    %40 = arith.subf %38, %39 : vector<1x256xf32>
    %cst_21 = arith.constant 0.000000e+00 : f32
    %41 = vector.broadcast %cst_21 : f32 to vector<1x256xf32>
    %42 = arith.maximumf %40, %41 : vector<1x256xf32>
    %cst_22 = arith.constant 8.000000e-01 : f32
    %43 = vector.broadcast %cst_22 : f32 to vector<1x256xf32>
    %44 = arith.addf %42, %43 : vector<1x256xf32>
    %45 = math.rsqrt %44 : vector<1x256xf32>
    %46 = arith.mulf %9, %45 : vector<1x256xf32>
    %47 = arith.mulf %33, %46 : vector<1x256xf32>
    %48 = arith.subf %10, %47 : vector<1x256xf32>
    %49 = vector.broadcast %46 : vector<1x256xf32> to vector<8x256xf32>
    %50 = arith.mulf %29, %49 : vector<8x256xf32>
    %51 = vector.broadcast %48 : vector<1x256xf32> to vector<8x256xf32>
    %52 = arith.addf %50, %51 : vector<8x256xf32>
    %cst_23 = arith.constant 2.000000e-01 : f32
    %53 = vector.broadcast %cst_23 : f32 to vector<8x256xf32>
    %54 = arith.mulf %53, %52 : vector<8x256xf32>
    %55 = arith.maximumf %52, %54 : vector<8x256xf32>
    %c1_i32_24 = arith.constant 1 : i32
    %56 = tpu.memref_slice %arg12[%c1_i32_24] : memref<4x!tpu.dma_semaphore, #tpu.memory_space<semaphore_mem>> -> memref<1x!tpu.dma_semaphore, #tpu.memory_space<semaphore_mem>>
    %57 = tpu.memref_squeeze %56 : memref<1x!tpu.dma_semaphore, #tpu.memory_space<semaphore_mem>> -> memref<!tpu.dma_semaphore, #tpu.memory_space<semaphore_mem>>
    tpu.wait_dma2 semaphore(%57 : memref<!tpu.dma_semaphore, #tpu.memory_space<semaphore_mem>>) src(%arg4 : memref<256x512xbf16, #tpu.memory_space<any>>) dst(%arg9 : memref<256x512xbf16, #tpu.memory_space<vmem>>)
    %c0_25 = arith.constant 0 : index
    %c0_26 = arith.constant 0 : index
    %58 = vector.load %arg9[%c0_25, %c0_26] : memref<256x512xbf16, #tpu.memory_space<vmem>>, vector<256x512xbf16>
    %59 = arith.truncf %55 : vector<8x256xf32> to vector<8x256xbf16>
    %cst_27 = arith.constant dense<0.000000e+00> : vector<8x512xf32>
    %60 = tpu.matmul %59, %58, %cst_27 {dimension_numbers = #tpu.dot_dimension_numbers<[1], [0], [0], [1], [0, 0, 1, 1], [], []>} : vector<8x256xbf16>, vector<256x512xbf16>, vector<8x512xf32> -> vector<8x512xf32>
    %cst_28 = arith.constant dense<0.000000e+00> : vector<512xf32>
    %61 = vector.multi_reduction <add>, %60, %cst_28 [0] : vector<8x512xf32> to vector<512xf32>
    %62 = vector.shape_cast %61 : vector<512xf32> to vector<1x512xf32>
    %cst_29 = arith.constant 8.000000e+00 : f32
    %63 = vector.broadcast %cst_29 : f32 to vector<1x512xf32>
    %64 = arith.divf %62, %63 : vector<1x512xf32>
    %65 = arith.mulf %60, %60 : vector<8x512xf32>
    %cst_30 = arith.constant dense<0.000000e+00> : vector<512xf32>
    %66 = vector.multi_reduction <add>, %65, %cst_30 [0] : vector<8x512xf32> to vector<512xf32>
    %67 = vector.shape_cast %66 : vector<512xf32> to vector<1x512xf32>
    %cst_31 = arith.constant 8.000000e+00 : f32
    %68 = vector.broadcast %cst_31 : f32 to vector<1x512xf32>
    %69 = arith.divf %67, %68 : vector<1x512xf32>
    %70 = arith.mulf %64, %64 : vector<1x512xf32>
    %71 = arith.subf %69, %70 : vector<1x512xf32>
    %cst_32 = arith.constant 0.000000e+00 : f32
    %72 = vector.broadcast %cst_32 : f32 to vector<1x512xf32>
    %73 = arith.maximumf %71, %72 : vector<1x512xf32>
    %cst_33 = arith.constant 8.000000e-01 : f32
    %74 = vector.broadcast %cst_33 : f32 to vector<1x512xf32>
    %75 = arith.addf %73, %74 : vector<1x512xf32>
    %76 = math.rsqrt %75 : vector<1x512xf32>
    %77 = arith.mulf %11, %76 : vector<1x512xf32>
    %78 = arith.mulf %64, %77 : vector<1x512xf32>
    %79 = arith.subf %12, %78 : vector<1x512xf32>
    %80 = vector.broadcast %77 : vector<1x512xf32> to vector<8x512xf32>
    %81 = arith.mulf %60, %80 : vector<8x512xf32>
    %82 = vector.broadcast %79 : vector<1x512xf32> to vector<8x512xf32>
    %83 = arith.addf %81, %82 : vector<8x512xf32>
    %cst_34 = arith.constant 2.000000e-01 : f32
    %84 = vector.broadcast %cst_34 : f32 to vector<8x512xf32>
    %85 = arith.mulf %84, %83 : vector<8x512xf32>
    %86 = arith.maximumf %83, %85 : vector<8x512xf32>
    %c2_i32_35 = arith.constant 2 : i32
    %87 = tpu.memref_slice %arg12[%c2_i32_35] : memref<4x!tpu.dma_semaphore, #tpu.memory_space<semaphore_mem>> -> memref<1x!tpu.dma_semaphore, #tpu.memory_space<semaphore_mem>>
    %88 = tpu.memref_squeeze %87 : memref<1x!tpu.dma_semaphore, #tpu.memory_space<semaphore_mem>> -> memref<!tpu.dma_semaphore, #tpu.memory_space<semaphore_mem>>
    tpu.wait_dma2 semaphore(%88 : memref<!tpu.dma_semaphore, #tpu.memory_space<semaphore_mem>>) src(%arg5 : memref<512x1024xbf16, #tpu.memory_space<any>>) dst(%arg10 : memref<512x1024xbf16, #tpu.memory_space<vmem>>)
    %c0_36 = arith.constant 0 : index
    %c0_37 = arith.constant 0 : index
    %89 = vector.load %arg10[%c0_36, %c0_37] : memref<512x1024xbf16, #tpu.memory_space<vmem>>, vector<512x1024xbf16>
    %90 = arith.truncf %86 : vector<8x512xf32> to vector<8x512xbf16>
    %cst_38 = arith.constant dense<0.000000e+00> : vector<8x1024xf32>
    %91 = tpu.matmul %90, %89, %cst_38 {dimension_numbers = #tpu.dot_dimension_numbers<[1], [0], [0], [1], [0, 0, 1, 1], [], []>} : vector<8x512xbf16>, vector<512x1024xbf16>, vector<8x1024xf32> -> vector<8x1024xf32>
    %cst_39 = arith.constant dense<0.000000e+00> : vector<1024xf32>
    %92 = vector.multi_reduction <add>, %91, %cst_39 [0] : vector<8x1024xf32> to vector<1024xf32>
    %93 = vector.shape_cast %92 : vector<1024xf32> to vector<1x1024xf32>
    %cst_40 = arith.constant 8.000000e+00 : f32
    %94 = vector.broadcast %cst_40 : f32 to vector<1x1024xf32>
    %95 = arith.divf %93, %94 : vector<1x1024xf32>
    %96 = arith.mulf %91, %91 : vector<8x1024xf32>
    %cst_41 = arith.constant dense<0.000000e+00> : vector<1024xf32>
    %97 = vector.multi_reduction <add>, %96, %cst_41 [0] : vector<8x1024xf32> to vector<1024xf32>
    %98 = vector.shape_cast %97 : vector<1024xf32> to vector<1x1024xf32>
    %cst_42 = arith.constant 8.000000e+00 : f32
    %99 = vector.broadcast %cst_42 : f32 to vector<1x1024xf32>
    %100 = arith.divf %98, %99 : vector<1x1024xf32>
    %101 = arith.mulf %95, %95 : vector<1x1024xf32>
    %102 = arith.subf %100, %101 : vector<1x1024xf32>
    %cst_43 = arith.constant 0.000000e+00 : f32
    %103 = vector.broadcast %cst_43 : f32 to vector<1x1024xf32>
    %104 = arith.maximumf %102, %103 : vector<1x1024xf32>
    %cst_44 = arith.constant 8.000000e-01 : f32
    %105 = vector.broadcast %cst_44 : f32 to vector<1x1024xf32>
    %106 = arith.addf %104, %105 : vector<1x1024xf32>
    %107 = math.rsqrt %106 : vector<1x1024xf32>
    %108 = arith.mulf %13, %107 : vector<1x1024xf32>
    %109 = arith.mulf %95, %108 : vector<1x1024xf32>
    %110 = arith.subf %14, %109 : vector<1x1024xf32>
    %111 = vector.broadcast %108 : vector<1x1024xf32> to vector<8x1024xf32>
    %112 = arith.mulf %91, %111 : vector<8x1024xf32>
    %113 = vector.broadcast %110 : vector<1x1024xf32> to vector<8x1024xf32>
    %114 = arith.addf %112, %113 : vector<8x1024xf32>
    %cst_45 = arith.constant 2.000000e-01 : f32
    %115 = vector.broadcast %cst_45 : f32 to vector<8x1024xf32>
    %116 = arith.mulf %115, %114 : vector<8x1024xf32>
    %117 = arith.maximumf %114, %116 : vector<8x1024xf32>
    %c3_i32_46 = arith.constant 3 : i32
    %118 = tpu.memref_slice %arg12[%c3_i32_46] : memref<4x!tpu.dma_semaphore, #tpu.memory_space<semaphore_mem>> -> memref<1x!tpu.dma_semaphore, #tpu.memory_space<semaphore_mem>>
    %119 = tpu.memref_squeeze %118 : memref<1x!tpu.dma_semaphore, #tpu.memory_space<semaphore_mem>> -> memref<!tpu.dma_semaphore, #tpu.memory_space<semaphore_mem>>
    tpu.wait_dma2 semaphore(%119 : memref<!tpu.dma_semaphore, #tpu.memory_space<semaphore_mem>>) src(%arg6 : memref<1024x128xbf16, #tpu.memory_space<any>>) dst(%arg11 : memref<1024x128xbf16, #tpu.memory_space<vmem>>)
    %c0_47 = arith.constant 0 : index
    %c0_48 = arith.constant 0 : index
    %120 = vector.load %arg11[%c0_47, %c0_48] : memref<1024x128xbf16, #tpu.memory_space<vmem>>, vector<1024x128xbf16>
    %121 = arith.truncf %117 : vector<8x1024xf32> to vector<8x1024xbf16>
    %cst_49 = arith.constant dense<0.000000e+00> : vector<8x128xf32>
    %122 = tpu.matmul %121, %120, %cst_49 {dimension_numbers = #tpu.dot_dimension_numbers<[1], [0], [0], [1], [0, 0, 1, 1], [], []>} : vector<8x1024xbf16>, vector<1024x128xbf16>, vector<8x128xf32> -> vector<8x128xf32>
    %123 = vector.broadcast %15 : vector<1x128xf32> to vector<8x128xf32>
    %124 = arith.addf %122, %123 : vector<8x128xf32>
    %125 = math.tanh %124 : vector<8x128xf32>
    %c0_50 = arith.constant 0 : index
    %c0_51 = arith.constant 0 : index
    %126 = vector.load %arg7[%c0_50, %c0_51] : memref<8x128xf32, #tpu.memory_space<vmem>>, vector<8x128xf32>
    tpu.vector_store %arg7[%c0_50, %c0_51], %125 {strides = array<i32>} : memref<8x128xf32, #tpu.memory_space<vmem>>, vector<8x128xf32>,
    return
  }
}

</mosaic_0001>

<bundles_post_ra>
// kernel: generator_forward.1
= control target key start
LH: loop header
LB: loop body
LE: loop exit
PB: predicated region body
PF: predicated region fallthrough
CT: control target
= control target key end

     0   :  { %12 = vsyncpa [#allocation8], 0  ;;  %s5339_s0 = inlined_call_operand.hbm [shape: f32[8,16], index: 0, kind: input, shape index: {}]   ;;  %s5340_s1 = inlined_call_operand.hbm [shape: bf16[16,128], index: 1, kind: input, shape index: {}]   ;;  %s5341_s2 = inlined_call_operand.hbm [shape: f32[1,3840], index: 2, kind: input, shape index: {}]   ;;  %s5342_s3 = inlined_call_operand.hbm [shape: bf16[128,256], index: 3, kind: input, shape index: {}]   ;;  %s5343_s4 = inlined_call_operand.hbm [shape: bf16[256,512], index: 4, kind: input, shape index: {}]   ;;  %s5344_s5 = inlined_call_operand.hbm [shape: bf16[512,1024], index: 5, kind: input, shape index: {}]   ;;  %s5345_s6 = inlined_call_operand.hbm [shape: bf16[1024,128], index: 6, kind: input, shape index: {}]   ;;  %s5346_s7 = inlined_call_operand.vmem [shape: f32[8,128], index: 7, kind: output, shape index: {}]  }
   0x1   :  { %13 = vsyncpa [#allocation10], 0  ;;  %s4981_s24 = smov [#allocation9]  }
   0x2   :  { %s29_s25 = sshll.u32 %s4981_s24, 4  ;;  %s30_s25 = int_to_ptr.vmem [resolvable:$true] %s29_s25 }
   0x3   :  { %s4837_s26 = scalar_lea.vmem %s30_s25, 128  ;;  %p4842_p1 = scmp.lt.s32.totalorder %s30_s25, %s30_s25 }
   0x4   :  { %p4838_p0 = scmp.ne.s32.totalorder %s30_s25, %s4837_s26  ;;  %p4843_p2 = scmp.lt.s32.totalorder %s4837_s26, %s4837_s26 }
   0x6   :  { %p4844_p3 = por %p4843_p2, %p4842_p1 }
   0x8   :  { %p4845_p4 = pnand %p4844_p3, %p4838_p0 }
   0xa   :  { %4848 = shalt.err (!%p4845_p4)
}
   0xb   :  { %s4982_s27 = smov 64   ;;  %s4983_s28 = smov 4  }
   0xc   :  { %35 = dma.hbm_to_vmem [thread:$0]  %s5340_s1, 128, %s30_s25, [#allocation10], %s4982_s27, %s4982_s27, %s4983_s28  }
   0xd   :  { %s4984_s8 = smov [#allocation7]   ;;  %s4985_s10 = smov [#allocation11]  }
   0xe   :  { %s20_s9 = sshll.u32 %s4984_s8, 4  ;;  %s42_s11 = sshll.u32 %s4985_s10, 4  ;;  %s21_s9 = int_to_ptr.vmem [resolvable:$true] %s20_s9  ;;  %s43_s11 = int_to_ptr.vmem [resolvable:$true] %s42_s11 }
   0xf   :  { %s4857_s12 = scalar_lea.vmem %s21_s9, 128  ;;  %p4862_p6 = scmp.lt.s32.totalorder %s21_s9, %s21_s9 }
  0x10   :  { %p4858_p5 = scmp.ne.s32.totalorder %s21_s9, %s4857_s12  ;;  %p4863_p7 = scmp.lt.s32.totalorder %s4857_s12, %s4857_s12 }
  0x12   :  { %p4864_p8 = por %p4863_p7, %p4862_p6 }
  0x14   :  { %p4865_p9 = pnand %p4864_p8, %p4858_p5 }
  0x16   :  { %4868 = shalt.err (!%p4865_p9)
}
  0x17   :  { %23 = dma.hbm_to_vmem [thread:$0]  %s5339_s0, 128, %s21_s9, [#allocation8]  }
  0x18   :  { %s4877_s15 = scalar_lea.vmem %s43_s11, 480  ;;  %p4882_p11 = scmp.lt.s32.totalorder %s43_s11, %s43_s11 }
  0x19   :  { %p4878_p10 = scmp.ne.s32.totalorder %s43_s11, %s4877_s15  ;;  %p4883_p12 = scmp.lt.s32.totalorder %s4877_s15, %s4877_s15 }
  0x1b   :  { %p4884_p13 = por %p4883_p12, %p4882_p11 }
  0x1d   :  { %p4885_p0 = pnand %p4884_p13, %p4878_p10 }
  0x1f   :  { %4888 = shalt.err (!%p4885_p0)
}
  0x20   :  { %45 = dma.hbm_to_vmem [thread:$0]  %s5341_s2, 480, %s43_s11, [#allocation10]  }
  0x21   :  { %4969 = dma.done.wait [#allocation8], 128  }
  0x22   :  { %4970 = vsyncadd [#allocation8], 4294967168 }
  0x23   :  { %4971 = dma.done.wait [#allocation10], 608  }
  0x24   :  { %4972 = vsyncadd [#allocation10], 4294966688  ;;  %v4986_v0 = vmov 0.0   ;;  %vm4987_vm0 = vmmov 0   ;;  %v5043_v1 = vld [vmem:[#allocation11 + $0x1] sm:$0x3] }
  0x25   :  { %4595 = vmatprep.subr.bf16.mxu0 %v4986_v0  ;;  %4597 = vmatprep.mubr.msk.bf16.mxu0 %vm4987_vm0, %v4986_v0  ;;  %v5045_v2 = vld [vmem:[#allocation11 + $0x3] sm:$0x3]  ;;  %v5047_v3 = vld [vmem:[#allocation11 + $0x5] sm:$0xf]  ;;  %v5049_v4 = vld [vmem:[#allocation11 + $0x9] sm:$0xf] }
  0x26   :  { %v5051_v5 = vld [vmem:[#allocation11 + $0xd] sm:$0xff]  ;;  %v5053_v6 = vld [vmem:[#allocation11 + $0x15] sm:$0xff]  ;;  %v5055_v7 = vld [vmem:[#allocation11 + $0x1d] ss:$0 sm:$0xff]  ;;  %vm127_vm1 = vcmask 130048   ;;  %s4988_s0 = smov [#allocation2]  }
  0x27   :  { %v4614_v8 = vld [vmem:[#allocation9] sm:$0xff]   ;;  %v111_v9 = vld [vmem:[#allocation7] sm:$0xff]  ;;  %s63_s2 = sshll.u32 %s4988_s0, 4  ;;  %s4989_s17 = smov [#allocation3]   ;;  %s64_s2 = int_to_ptr.vmem [resolvable:$true] %s63_s2 }
  0x28   :  { %v114_v10 = vpack.c.bf16 %v111_v9, %v111_v9  ;;  %4596 = vmatpush3.bf16.msra.mxu0 %v4614_v8  ;;  %s75_s18 = sshll.u32 %s4989_s17, 4  ;;  %s4897_s19 = scalar_lea.vmem %s64_s2, 2048  ;;  %s76_s18 = int_to_ptr.vmem [resolvable:$true] %s75_s18 }
  0x29   :  { %p4898_p1 = scmp.ne.s32.totalorder %s64_s2, %s4897_s19  ;;  %p4902_p2 = scmp.lt.s32.totalorder %s64_s2, %s64_s2 }
  0x2a   :  { %p4903_p3 = scmp.lt.s32.totalorder %s4897_s19, %s4897_s19 }
  0x2b   :  { %4598 = vmatmul.mubr.msk.bf16.vlgmr.msra.gmra.mxu0 %vm127_vm1, %v114_v10 }
  0x2c   :  { %p4904_p4 = por %p4903_p3, %p4902_p2 }
  0x2e   :  { %p4905_p5 = pnand %p4904_p4, %p4898_p1 }
  0x30   :  { %4908 = shalt.err (!%p4905_p5)  }
  0x31   :  { %66 = dma.hbm_to_vmem [thread:$0]  %s5342_s3, 2048, %s64_s2, [#allocation6] }
  0x32   :  { %s4917_s22 = scalar_lea.vmem %s76_s18, 8192  ;;  %p4922_p7 = scmp.lt.s32.totalorder %s76_s18, %s76_s18 }
  0x33   :  { %p4918_p6 = scmp.ne.s32.totalorder %s76_s18, %s4917_s22  ;;  %p4923_p8 = scmp.lt.s32.totalorder %s4917_s22, %s4917_s22 }
  0x35   :  { %p4924_p9 = por %p4923_p8, %p4922_p7 }
  0x37   :  { %p4925_p10 = pnand %p4924_p9, %p4918_p6 }
  0x39   :  { %4928 = shalt.err (!%p4925_p10)  }
  0x3a   :  { %78 = dma.hbm_to_vmem [thread:$0]  %s5343_s4, 8192, %s76_s18, [#allocation6 + $0x1] }
  0x3b   :  { %s4990_s25 = smov [#allocation4]   ;;  %s4991_s27 = smov [#allocation5]  }
  0x3c   :  { %s87_s26 = sshll.u32 %s4990_s25, 4  ;;  %s99_s28 = sshll.u32 %s4991_s27, 4  ;;  %s88_s26 = int_to_ptr.vmem [resolvable:$true] %s87_s26  ;;  %s100_s28 = int_to_ptr.vmem [resolvable:$true] %s99_s28 }
  0x3d   :  { %s4937_s29 = scalar_lea.vmem %s88_s26, 32768  ;;  %p4942_p12 = scmp.lt.s32.totalorder %s88_s26, %s88_s26 }
  0x3e   :  { %p4938_p11 = scmp.ne.s32.totalorder %s88_s26, %s4937_s29  ;;  %p4943_p13 = scmp.lt.s32.totalorder %s4937_s29, %s4937_s29 }
  0x40   :  { %p4944_p0 = por %p4943_p13, %p4942_p12 }
  0x42   :  { %p4945_p1 = pnand %p4944_p0, %p4938_p11 }
  0x44   :  { %4948 = shalt.err (!%p4945_p1)  }
  0x45   :  { %90 = dma.hbm_to_vmem [thread:$0]  %s5344_s5, 32768, %s88_s26, [#allocation6 + $0x2] }
  0x46   :  { %s4957_s8 = scalar_lea.vmem %s100_s28, 8192  ;;  %p4962_p3 = scmp.lt.s32.totalorder %s100_s28, %s100_s28 }
  0x47   :  { %p4958_p2 = scmp.ne.s32.totalorder %s100_s28, %s4957_s8  ;;  %p4963_p4 = scmp.lt.s32.totalorder %s4957_s8, %s4957_s8 }
  0x49   :  { %p4964_p5 = por %p4963_p4, %p4962_p3 }
  0x4b   :  { %p4965_p6 = pnand %p4964_p5, %p4958_p2 }
  0x4d   :  { %4968 = shalt.err (!%p4965_p6)  }
  0x4e   :  { %102 = dma.hbm_to_vmem [thread:$0]  %s5345_s6, 8192, %s100_s28, [#allocation6 + $0x3]  ;;  %v4097_v11 = vld [vmem:[#allocation11] ss:$0 sm:$0xff] }
  0xeb   :  { %v165_v12 = vpop.f32.mrf.mxu0 }
  0xec   :  { %v166_v13 = vadd.f32 %v4097_v11, %v165_v12 }
  0xed   :  { %v4599_v14 = vpop.f32.mrf.mxu0 }
  0xee   :  { %v171_v15 = vmul.f32 0.2, %v166_v13 }
  0xef   :  { %v168_v16 = vpop.f32.mrf.mxu0 }
  0xf0   :  { %v172_v17 = vmax.f32 %v166_v13, %v171_v15 }
  0xf1   :  { %v4600_v18 = vpop.f32.mrf.mxu0 }
  0xf2   :  { %4973 = dma.done.wait [#allocation6], 2048 }
  0xf3   :  { %4974 = vsyncadd [#allocation6], 4294965248  ;;  %v4992_v19 = vmov 0   ;;  %v4615_v20 = vld [vmem:[#allocation2 + $0x74] ss:$8 sps:$4 sm:$0xff]   ;;  %v193_v36 = vpack.c.bf16 %v172_v17, %v172_v17 }
  0xf4   :  { %306 = vmatprep.mubr.bf16.mxu1 %v4992_v19  ;;  %v4617_v21 = vld [vmem:[#allocation2 + $0x70] ss:$8 sps:$4 sm:$0xff]   ;;  %274 = vmatprep.subr.bf16.mxu1 %v4615_v20  ;;  %v4618_v22 = vld [vmem:[#allocation2 + $0x64] ss:$8 sps:$4 sm:$0xff]   ;;  %v4620_v23 = vld [vmem:[#allocation2 + $0x60] ss:$8 sps:$4 sm:$0xff]  }
  0xf5   :  { %275 = vmatpush1.bf16.msra.mxu1 %v4617_v21  ;;  %v4621_v24 = vld [vmem:[#allocation2 + $0x54] ss:$8 sps:$4 sm:$0xff]   ;;  %v4623_v25 = vld [vmem:[#allocation2 + $0x50] ss:$8 sps:$4 sm:$0xff]   ;;  %v4624_v26 = vld [vmem:[#allocation2 + $0x44] ss:$8 sps:$4 sm:$0xff]  }
  0xf6   :  { %276 = vmatprep.subr.bf16.mxu1 %v4618_v22  ;;  %v4626_v27 = vld [vmem:[#allocation2 + $0x40] ss:$8 sps:$4 sm:$0xff]   ;;  %v4627_v28 = vld [vmem:[#allocation2 + $0x34] ss:$8 sps:$4 sm:$0xff]   ;;  %v4629_v29 = vld [vmem:[#allocation2 + $0x30] ss:$8 sps:$4 sm:$0xff]  }
  0xf7   :  { %v4630_v30 = vld [vmem:[#allocation2 + $0x24] ss:$8 sps:$4 sm:$0xff]   ;;  %v4632_v31 = vld [vmem:[#allocation2 + $0x20] ss:$8 sps:$4 sm:$0xff]   ;;  %v4633_v32 = vld [vmem:[#allocation2 + $0x14] ss:$8 sps:$4 sm:$0xff]  }
  0xf8   :  { %v4635_v33 = vld [vmem:[#allocation2 + $0x10] ss:$8 sps:$4 sm:$0xff]   ;;  %v4636_v34 = vld [vmem:[#allocation2 + $0x4] ss:$8 sps:$4 sm:$0xff]   ;;  %v4638_v35 = vld [vmem:[#allocation2] ss:$8 sps:$4 sm:$0xff]  }
  0xf9   :  { %277 = vmatpush1.bf16.msra.mxu1 %v4620_v23  ;;  %v4993_v22 = vmov 1966171168  }
  0xfa   :  { %278 = vmatprep.subr.bf16.mxu1 %v4621_v24  ;;  %v360_v23 = vunpack.c.l.s4 %v4993_v22  ;;  %v362_v24 = vlaneseq }
  0xfd   :  { %279 = vmatpush1.bf16.msra.mxu1 %v4623_v25  ;;  %v361_v25 = vunpack.c.0.s8 %v360_v23 }
  0xfe   :  { %280 = vmatprep.subr.bf16.mxu1 %v4624_v26  ;;  %v5081_v26 = vshrl.u32 %v362_v24, 7 }
 0x101   :  { %281 = vmatpush1.bf16.msra.mxu1 %v4626_v27 }
 0x102   :  { %282 = vmatprep.subr.bf16.mxu1 %v4627_v28  ;;  %v5084_v28 = vsub.s32 %v361_v25, %v5081_v26 }
 0x105   :  { %283 = vmatpush1.bf16.msra.mxu1 %v4629_v29 }
 0x106   :  { %284 = vmatprep.subr.bf16.mxu1 %v4630_v30 }
 0x109   :  { %285 = vmatpush1.bf16.msra.mxu1 %v4632_v31 }
 0x10a   :  { %286 = vmatprep.subr.bf16.mxu1 %v4633_v32 }
 0x10d   :  { %287 = vmatpush1.bf16.msra.mxu1 %v4635_v33  ;;  %v5089_v33 = vsub.s32 0, %v5081_v26 }
 0x10e   :  { %288 = vmatprep.subr.bf16.mxu1 %v4636_v34  ;;  %v5092_v34 = vsub.s32 1, %v5081_v26 }
 0x111   :  { %289 = vmatpush1.bf16.msra.mxu1 %v4638_v35 }
 0x114   :  { %307 = vmatmul.mubr.bf16.vlgmr.msra.gmra.mxu1 %v193_v36 }
 0x1d4   :  { %v5069_v37 = vpop.f32.mrf.mxu1 }
 0x1d5   :  { %v315_v38 = vrot.slane %v5069_v37, 4  ;;  %v330_v39 = vmul.f32 %v5069_v37, %v5069_v37 }
 0x1d6   :  { %v5074_v40 = vpop.f32.mrf.mxu1 }
 0x1d7   :  { %v316_v41 = vadd.f32 %v315_v38, %v5069_v37  ;;  %v332_v42 = vrot.slane %v330_v39, 4  ;;  %v321_v43 = vrot.slane %v5074_v40, 4  ;;  %v331_v44 = vmul.f32 %v5074_v40, %v5074_v40 }
 0x1d8   :  { %v312_v45 = vpop.f32.mrf.mxu1 }
 0x1d9   :  { %v317_v46 = vrot.slane %v316_v41, 2  ;;  %v333_v47 = vadd.f32 %v332_v42, %v330_v39  ;;  %v322_v48 = vadd.f32 %v321_v43, %v5074_v40  ;;  %v338_v49 = vrot.slane %v331_v44, 4 }
 0x1da   :  { %v313_v50 = vpop.f32.mrf.mxu1 }
 0x1db   :  { %v318_v51 = vadd.f32 %v317_v46, %v316_v41  ;;  %v334_v52 = vrot.slane %v333_v47, 2  ;;  %v323_v53 = vrot.slane %v322_v48, 2  ;;  %v339_v54 = vadd.f32 %v338_v49, %v331_v44 }
 0x1dd   :  { %v319_v55 = vrot.slane %v318_v51, 1  ;;  %v335_v56 = vadd.f32 %v334_v52, %v333_v47  ;;  %v324_v57 = vadd.f32 %v323_v53, %v322_v48  ;;  %v340_v58 = vrot.slane %v339_v54, 2 }
 0x1df   :  { %v320_v59 = vadd.f32 %v319_v55, %v318_v51  ;;  %v336_v60 = vrot.slane %v335_v56, 1  ;;  %v325_v61 = vrot.slane %v324_v57, 1  ;;  %v341_v62 = vadd.f32 %v340_v58, %v339_v54 }
 0x1e1   :  { %v328_v63 = vmul.f32 0.125, %v320_v59  ;;  %v337_v0 = vadd.f32 %v336_v60, %v335_v56  ;;  %v326_v8 = vadd.f32 %v325_v61, %v324_v57  ;;  %v342_v9 = vrot.slane %v341_v62, 1 }
 0x1e3   :  { %v344_v10 = vmul.f32 0.125, %v337_v0  ;;  %v346_v11 = vmul.f32 %v328_v63, %v328_v63  ;;  %v329_v12 = vmul.f32 0.125, %v326_v8  ;;  %v343_v13 = vadd.f32 %v342_v9, %v341_v62 }
 0x1e5   :  { %v348_v14 = vsub.f32 %v344_v10, %v346_v11  ;;  %v345_v15 = vmul.f32 0.125, %v343_v13  ;;  %v347_v16 = vmul.f32 %v329_v12, %v329_v12 }
 0x1e7   :  { %v350_v17 = vmax.f32 %v348_v14, 0.0  ;;  %v349_v18 = vsub.f32 %v345_v15, %v347_v16 }
 0x1e9   :  { %v352_v19 = vadd.f32 0.8, %v350_v17  ;;  %v351_v20 = vmax.f32 %v349_v18, 0.0 }
 0x1eb   :  { %v353_v21 = vadd.f32 0.8, %v351_v20  ;;  %4639 = vrsqrt.f32 %v352_v19 }
 0x1ed   :  { %4641 = vrsqrt.f32 %v353_v21 }
 0x1f8   :  { %v4640_v27 = vpop.eup %4639 }
 0x1fa   :  { %v4642_v29 = vpop.eup %4641 }
 0x1fb   :  { %v358_v30 = vcombine.low %v4640_v27, %v4642_v29 }
 0x1fd   :  { %v365_v31 = vrot.slane %v358_v30, %v5084_v28 }
 0x1ff   :  { %v372_v32 = vrot.slane %v365_v31, %v5084_v28 }
 0x201   :  { %v374_v35 = vmul.f32 %v372_v32, %v5043_v1 }
 0x203   :  { %v379_v36 = vrot.slane %v374_v35, %v5089_v33  ;;  %v383_v38 = vrot.slane %v374_v35, %v5092_v34 }
 0x205   :  { %v386_v39 = vmul.f32 %v379_v36, %v328_v63  ;;  %v387_v41 = vmul.f32 %v383_v38, %v329_v12  ;;  %v407_v46 = vmul.f32 %v379_v36, %v5069_v37  ;;  %v408_v47 = vmul.f32 %v383_v38, %v5074_v40 }
 0x207   :  { %v390_v42 = vcombine.low %v386_v39, %v387_v41 }
 0x209   :  { %v397_v43 = vrot.slane %v390_v42, %v5084_v28 }
 0x20b   :  { %v404_v44 = vrot.slane %v397_v43, %v5084_v28 }
 0x20d   :  { %v406_v45 = vsub.f32 %v5045_v2, %v404_v44 }
 0x20f   :  { %v413_v48 = vrot.slane %v406_v45, %v5089_v33  ;;  %v417_v1 = vrot.slane %v406_v45, %v5092_v34 }
 0x211   :  { %v420_v49 = vadd.f32 %v413_v48, %v407_v46  ;;  %v421_v50 = vadd.f32 %v417_v1, %v408_v47 }
 0x213   :  { %v422_v51 = vmul.f32 0.2, %v420_v49  ;;  %v423_v52 = vmul.f32 0.2, %v421_v50 }
 0x215   :  { %v5104_v53 = vmax.f32 %v420_v49, %v422_v51  ;;  %v425_v54 = vmax.f32 %v421_v50, %v423_v52 }
 0x216   :  { %4975 = dma.done.wait [#allocation6 + $0x1], 8192 }
 0x217   :  { %4976 = vsyncadd [#allocation6 + $0x1], 4294959104  ;;  %v495_v55 = vpack.c.bf16 %v425_v54, %v425_v54  ;;  %v4643_v2 = vld [vmem:[#allocation3 + $0xe4] ss:$16 sps:$4 sm:$0xff]   ;;  %v4645_v37 = vld [vmem:[#allocation3 + $0xec] ss:$16 sps:$4 sm:$0xff]  }
 0x218   :  { %816 = vmatprep.subr.bf16.mxu0 %v4643_v2  ;;  %v4647_v40 = vld [vmem:[#allocation3 + $0xe0] ss:$16 sps:$4 sm:$0xff]   ;;  %v4648_v56 = vld [vmem:[#allocation3 + $0xe8] ss:$16 sps:$4 sm:$0xff]   ;;  %857 = vmatprep.subr.bf16.mxu1 %v4645_v37  ;;  %v4649_v57 = vld [vmem:[#allocation3 + $0xc4] ss:$16 sps:$4 sm:$0xff]  }
 0x219   :  { %848 = vmatprep.mubr.bf16.mxu0 %v495_v55  ;;  %889 = vmatprep.mubr.bf16.mxu1 %v495_v55  ;;  %v4651_v58 = vld [vmem:[#allocation3 + $0xcc] ss:$16 sps:$4 sm:$0xff]   ;;  %v4653_v59 = vld [vmem:[#allocation3 + $0xc0] ss:$16 sps:$4 sm:$0xff]   ;;  %v4654_v60 = vld [vmem:[#allocation3 + $0xc8] ss:$16 sps:$4 sm:$0xff]  }
 0x21a   :  { %817 = vmatpush1.bf16.msra.mxu0 %v4647_v40  ;;  %858 = vmatpush1.bf16.msra.mxu1 %v4648_v56  ;;  %v4655_v61 = vld [vmem:[#allocation3 + $0xa4] ss:$16 sps:$4 sm:$0xff]   ;;  %v4657_v62 = vld [vmem:[#allocation3 + $0xac] ss:$16 sps:$4 sm:$0xff]   ;;  %v4659_v63 = vld [vmem:[#allocation3 + $0xa0] ss:$16 sps:$4 sm:$0xff]  }
 0x21b   :  { %818 = vmatprep.subr.bf16.mxu0 %v4649_v57  ;;  %859 = vmatprep.subr.bf16.mxu1 %v4651_v58  ;;  %v4660_v0 = vld [vmem:[#allocation3 + $0xa8] ss:$16 sps:$4 sm:$0xff]   ;;  %v4661_v8 = vld [vmem:[#allocation3 + $0x84] ss:$16 sps:$4 sm:$0xff]   ;;  %v4663_v9 = vld [vmem:[#allocation3 + $0x8c] ss:$16 sps:$4 sm:$0xff]  }
 0x21c   :  { %v4665_v10 = vld [vmem:[#allocation3 + $0x80] ss:$16 sps:$4 sm:$0xff]   ;;  %v4666_v11 = vld [vmem:[#allocation3 + $0x88] ss:$16 sps:$4 sm:$0xff]   ;;  %v4667_v12 = vld [vmem:[#allocation3 + $0x64] ss:$16 sps:$4 sm:$0xff]  }
 0x21d   :  { %v4669_v13 = vld [vmem:[#allocation3 + $0x6c] ss:$16 sps:$4 sm:$0xff]   ;;  %v4671_v14 = vld [vmem:[#allocation3 + $0x60] ss:$16 sps:$4 sm:$0xff]   ;;  %v4672_v15 = vld [vmem:[#allocation3 + $0x68] ss:$16 sps:$4 sm:$0xff]  }
 0x21e   :  { %819 = vmatpush1.bf16.msra.mxu0 %v4653_v59  ;;  %860 = vmatpush1.bf16.msra.mxu1 %v4654_v60  ;;  %v4673_v16 = vld [vmem:[#allocation3 + $0x44] ss:$16 sps:$4 sm:$0xff]   ;;  %v4675_v17 = vld [vmem:[#allocation3 + $0x4c] ss:$16 sps:$4 sm:$0xff]   ;;  %v4677_v18 = vld [vmem:[#allocation3 + $0x40] ss:$16 sps:$4 sm:$0xff]  }
 0x21f   :  { %820 = vmatprep.subr.bf16.mxu0 %v4655_v61  ;;  %861 = vmatprep.subr.bf16.mxu1 %v4657_v62  ;;  %v4678_v19 = vld [vmem:[#allocation3 + $0x48] ss:$16 sps:$4 sm:$0xff]   ;;  %v4679_v20 = vld [vmem:[#allocation3 + $0x24] ss:$16 sps:$4 sm:$0xff]   ;;  %v4681_v21 = vld [vmem:[#allocation3 + $0x2c] ss:$16 sps:$4 sm:$0xff]  }
 0x220   :  { %v4683_v22 = vld [vmem:[#allocation3 + $0x20] ss:$16 sps:$4 sm:$0xff]   ;;  %v4684_v23 = vld [vmem:[#allocation3 + $0x28] ss:$16 sps:$4 sm:$0xff]   ;;  %v4685_v24 = vld [vmem:[#allocation3 + $0x4] ss:$16 sps:$4 sm:$0xff]  }
 0x221   :  { %v4687_v25 = vld [vmem:[#allocation3 + $0xc] ss:$16 sps:$4 sm:$0xff]   ;;  %v4689_v27 = vld [vmem:[#allocation3] ss:$16 sps:$4 sm:$0xff]   ;;  %v4690_v29 = vld [vmem:[#allocation3 + $0x8] ss:$16 sps:$4 sm:$0xff]  }
 0x222   :  { %821 = vmatpush1.bf16.msra.mxu0 %v4659_v63  ;;  %862 = vmatpush1.bf16.msra.mxu1 %v4660_v0  ;;  %v4691_v30 = vld [vmem:[#allocation3 + $0x1e4] ss:$16 sps:$4 sm:$0xff]   ;;  %v4693_v31 = vld [vmem:[#allocation3 + $0x1ec] ss:$16 sps:$4 sm:$0xff]   ;;  %v4695_v32 = vld [vmem:[#allocation3 + $0x1e0] ss:$16 sps:$4 sm:$0xff]   ;;  %v494_v63 = vpack.c.bf16 %v5104_v53, %v5104_v53 }
 0x223   :  { %822 = vmatprep.subr.bf16.mxu0 %v4661_v8  ;;  %863 = vmatprep.subr.bf16.mxu1 %v4663_v9  ;;  %v4696_v35 = vld [vmem:[#allocation3 + $0x1e8] ss:$16 sps:$4 sm:$0xff]   ;;  %v4697_v36 = vld [vmem:[#allocation3 + $0x1c4] ss:$16 sps:$4 sm:$0xff]   ;;  %v4699_v38 = vld [vmem:[#allocation3 + $0x1cc] ss:$16 sps:$4 sm:$0xff]  }
 0x224   :  { %v4701_v39 = vld [vmem:[#allocation3 + $0x1c0] ss:$16 sps:$4 sm:$0xff]   ;;  %v4702_v41 = vld [vmem:[#allocation3 + $0x1c8] ss:$16 sps:$4 sm:$0xff]   ;;  %v4703_v42 = vld [vmem:[#allocation3 + $0x1a4] ss:$16 sps:$4 sm:$0xff]  }
 0x225   :  { %v4705_v43 = vld [vmem:[#allocation3 + $0x1ac] ss:$16 sps:$4 sm:$0xff]   ;;  %v4707_v44 = vld [vmem:[#allocation3 + $0x1a0] ss:$16 sps:$4 sm:$0xff]   ;;  %v4708_v45 = vld [vmem:[#allocation3 + $0x1a8] ss:$16 sps:$4 sm:$0xff]  }
 0x226   :  { %823 = vmatpush1.bf16.msra.mxu0 %v4665_v10  ;;  %864 = vmatpush1.bf16.msra.mxu1 %v4666_v11  ;;  %v4709_v46 = vld [vmem:[#allocation3 + $0x184] ss:$16 sps:$4 sm:$0xff]   ;;  %v4711_v47 = vld [vmem:[#allocation3 + $0x18c] ss:$16 sps:$4 sm:$0xff]   ;;  %v4713_v48 = vld [vmem:[#allocation3 + $0x180] ss:$16 sps:$4 sm:$0xff]  }
 0x227   :  { %824 = vmatprep.subr.bf16.mxu0 %v4667_v12  ;;  %865 = vmatprep.subr.bf16.mxu1 %v4669_v13  ;;  %v4714_v1 = vld [vmem:[#allocation3 + $0x188] ss:$16 sps:$4 sm:$0xff]   ;;  %v4715_v49 = vld [vmem:[#allocation3 + $0x164] ss:$16 sps:$4 sm:$0xff]   ;;  %v4717_v50 = vld [vmem:[#allocation3 + $0x16c] ss:$16 sps:$4 sm:$0xff]  }
 0x228   :  { %v4719_v51 = vld [vmem:[#allocation3 + $0x160] ss:$16 sps:$4 sm:$0xff]   ;;  %v4720_v52 = vld [vmem:[#allocation3 + $0x168] ss:$16 sps:$4 sm:$0xff]   ;;  %v4721_v54 = vld [vmem:[#allocation3 + $0x144] ss:$16 sps:$4 sm:$0xff]  }
 0x229   :  { %v4723_v55 = vld [vmem:[#allocation3 + $0x14c] ss:$16 sps:$4 sm:$0xff]   ;;  %v4725_v2 = vld [vmem:[#allocation3 + $0x140] ss:$16 sps:$4 sm:$0xff]   ;;  %v4726_v37 = vld [vmem:[#allocation3 + $0x148] ss:$16 sps:$4 sm:$0xff]  }
 0x22a   :  { %825 = vmatpush1.bf16.msra.mxu0 %v4671_v14  ;;  %866 = vmatpush1.bf16.msra.mxu1 %v4672_v15  ;;  %v4727_v40 = vld [vmem:[#allocation3 + $0x124] ss:$16 sps:$4 sm:$0xff]   ;;  %v4729_v56 = vld [vmem:[#allocation3 + $0x12c] ss:$16 sps:$4 sm:$0xff]   ;;  %v4731_v57 = vld [vmem:[#allocation3 + $0x120] ss:$16 sps:$4 sm:$0xff]  }
 0x22b   :  { %826 = vmatprep.subr.bf16.mxu0 %v4673_v16  ;;  %867 = vmatprep.subr.bf16.mxu1 %v4675_v17  ;;  %v4732_v58 = vld [vmem:[#allocation3 + $0x128] ss:$16 sps:$4 sm:$0xff]   ;;  %v4733_v59 = vld [vmem:[#allocation3 + $0x104] ss:$16 sps:$4 sm:$0xff]   ;;  %v4735_v60 = vld [vmem:[#allocation3 + $0x10c] ss:$16 sps:$4 sm:$0xff]  }
 0x22c   :  { %v4737_v61 = vld [vmem:[#allocation3 + $0x100] ss:$16 sps:$4 sm:$0xff]   ;;  %v4738_v62 = vld [vmem:[#allocation3 + $0x108] ss:$16 sps:$4 sm:$0xff]  }
 0x22e   :  { %827 = vmatpush1.bf16.msra.mxu0 %v4677_v18  ;;  %868 = vmatpush1.bf16.msra.mxu1 %v4678_v19 }
 0x22f   :  { %828 = vmatprep.subr.bf16.mxu0 %v4679_v20  ;;  %869 = vmatprep.subr.bf16.mxu1 %v4681_v21 }
 0x232   :  { %829 = vmatpush1.bf16.msra.mxu0 %v4683_v22  ;;  %870 = vmatpush1.bf16.msra.mxu1 %v4684_v23 }
 0x233   :  { %830 = vmatprep.subr.bf16.mxu0 %v4685_v24  ;;  %871 = vmatprep.subr.bf16.mxu1 %v4687_v25 }
 0x236   :  { %831 = vmatpush1.bf16.msra.mxu0 %v4689_v27  ;;  %872 = vmatpush1.bf16.msra.mxu1 %v4690_v29 }
 0x237   :  { %832 = vmatprep.subr.bf16.mxu0 %v4691_v30  ;;  %873 = vmatprep.subr.bf16.mxu1 %v4693_v31 }
 0x23a   :  { %833 = vmatpush2.bf16.msra.mxu0 %v4695_v32  ;;  %874 = vmatpush2.bf16.msra.mxu1 %v4696_v35 }
 0x23b   :  { %834 = vmatprep.subr.bf16.mxu0 %v4697_v36  ;;  %875 = vmatprep.subr.bf16.mxu1 %v4699_v38 }
 0x23e   :  { %835 = vmatpush2.bf16.msra.mxu0 %v4701_v39  ;;  %876 = vmatpush2.bf16.msra.mxu1 %v4702_v41 }
 0x23f   :  { %836 = vmatprep.subr.bf16.mxu0 %v4703_v42  ;;  %877 = vmatprep.subr.bf16.mxu1 %v4705_v43 }
 0x242   :  { %837 = vmatpush2.bf16.msra.mxu0 %v4707_v44  ;;  %878 = vmatpush2.bf16.msra.mxu1 %v4708_v45 }
 0x243   :  { %838 = vmatprep.subr.bf16.mxu0 %v4709_v46  ;;  %879 = vmatprep.subr.bf16.mxu1 %v4711_v47 }
 0x246   :  { %839 = vmatpush2.bf16.msra.mxu0 %v4713_v48  ;;  %880 = vmatpush2.bf16.msra.mxu1 %v4714_v1 }
 0x247   :  { %840 = vmatprep.subr.bf16.mxu0 %v4715_v49  ;;  %881 = vmatprep.subr.bf16.mxu1 %v4717_v50 }
 0x24a   :  { %841 = vmatpush2.bf16.msra.mxu0 %v4719_v51  ;;  %882 = vmatpush2.bf16.msra.mxu1 %v4720_v52 }
 0x24b   :  { %842 = vmatprep.subr.bf16.mxu0 %v4721_v54  ;;  %883 = vmatprep.subr.bf16.mxu1 %v4723_v55 }
 0x24e   :  { %843 = vmatpush2.bf16.msra.mxu0 %v4725_v2  ;;  %884 = vmatpush2.bf16.msra.mxu1 %v4726_v37 }
 0x24f   :  { %844 = vmatprep.subr.bf16.mxu0 %v4727_v40  ;;  %885 = vmatprep.subr.bf16.mxu1 %v4729_v56 }
 0x252   :  { %845 = vmatpush2.bf16.msra.mxu0 %v4731_v57  ;;  %886 = vmatpush2.bf16.msra.mxu1 %v4732_v58 }
 0x253   :  { %846 = vmatprep.subr.bf16.mxu0 %v4733_v59  ;;  %887 = vmatprep.subr.bf16.mxu1 %v4735_v60 }
 0x256   :  { %847 = vmatpush2.bf16.msra.mxu0 %v4737_v61  ;;  %888 = vmatpush2.bf16.msra.mxu1 %v4738_v62 }
 0x259   :  { %849 = vmatmul.mubr.bf16.vlgmr.msra.gmra.mxu0 %v494_v63  ;;  %890 = vmatmul.mubr.bf16.vlgmr.msra.gmra.mxu1 %v494_v63 }
 0x319   :  { %v5108_v0 = vpop.f32.mrf.mxu0  ;;  %v5110_v8 = vpop.f32.mrf.mxu1 }
 0x31a   :  { %v898_v9 = vrot.slane %v5108_v0, 4  ;;  %v926_v10 = vmul.f32 %v5108_v0, %v5108_v0  ;;  %v910_v11 = vrot.slane %v5110_v8, 4  ;;  %v928_v12 = vmul.f32 %v5110_v8, %v5110_v8 }
 0x31b   :  { %v5118_v13 = vpop.f32.mrf.mxu0  ;;  %v5120_v53 = vpop.f32.mrf.mxu1 }
 0x31c   :  { %v899_v14 = vadd.f32 %v898_v9, %v5108_v0  ;;  %v930_v15 = vrot.slane %v926_v10, 4  ;;  %v911_v16 = vadd.f32 %v910_v11, %v5110_v8  ;;  %v942_v17 = vrot.slane %v928_v12, 4 }
 0x31d   :  { %v904_v18 = vrot.slane %v5118_v13, 4  ;;  %v927_v19 = vmul.f32 %v5118_v13, %v5118_v13  ;;  %v916_v20 = vrot.slane %v5120_v53, 4  ;;  %v929_v21 = vmul.f32 %v5120_v53, %v5120_v53  ;;  %v854_v22 = vpop.f32.mrf.mxu0  ;;  %v895_v23 = vpop.f32.mrf.mxu1 }
 0x31e   :  { %v900_v24 = vrot.slane %v899_v14, 2  ;;  %v931_v25 = vadd.f32 %v930_v15, %v926_v10  ;;  %v912_v27 = vrot.slane %v911_v16, 2  ;;  %v943_v29 = vadd.f32 %v942_v17, %v928_v12 }
 0x31f   :  { %v905_v30 = vadd.f32 %v904_v18, %v5118_v13  ;;  %v936_v31 = vrot.slane %v927_v19, 4  ;;  %v917_v32 = vadd.f32 %v916_v20, %v5120_v53  ;;  %v948_v35 = vrot.slane %v929_v21, 4  ;;  %v855_v36 = vpop.f32.mrf.mxu0  ;;  %v896_v38 = vpop.f32.mrf.mxu1 }
 0x320   :  { %v901_v39 = vadd.f32 %v900_v24, %v899_v14  ;;  %v932_v41 = vrot.slane %v931_v25, 2  ;;  %v913_v42 = vadd.f32 %v912_v27, %v911_v16  ;;  %v944_v43 = vrot.slane %v943_v29, 2 }
 0x321   :  { %v906_v44 = vrot.slane %v905_v30, 2  ;;  %v937_v45 = vadd.f32 %v936_v31, %v927_v19  ;;  %v918_v46 = vrot.slane %v917_v32, 2  ;;  %v949_v47 = vadd.f32 %v948_v35, %v929_v21 }
 0x322   :  { %v902_v48 = vrot.slane %v901_v39, 1  ;;  %v933_v1 = vadd.f32 %v932_v41, %v931_v25  ;;  %v914_v49 = vrot.slane %v913_v42, 1  ;;  %v945_v50 = vadd.f32 %v944_v43, %v943_v29 }
 0x323   :  { %v907_v51 = vadd.f32 %v906_v44, %v905_v30  ;;  %v938_v52 = vrot.slane %v937_v45, 2  ;;  %v919_v54 = vadd.f32 %v918_v46, %v917_v32  ;;  %v950_v55 = vrot.slane %v949_v47, 2 }
 0x324   :  { %v903_v2 = vadd.f32 %v902_v48, %v901_v39  ;;  %v934_v37 = vrot.slane %v933_v1, 1  ;;  %v915_v40 = vadd.f32 %v914_v49, %v913_v42  ;;  %v946_v56 = vrot.slane %v945_v50, 1 }
 0x325   :  { %v908_v57 = vrot.slane %v907_v51, 1  ;;  %v939_v58 = vadd.f32 %v938_v52, %v937_v45  ;;  %v920_v59 = vrot.slane %v919_v54, 1  ;;  %v951_v60 = vadd.f32 %v950_v55, %v949_v47 }
 0x326   :  { %v922_v61 = vmul.f32 0.125, %v903_v2  ;;  %v935_v62 = vadd.f32 %v934_v37, %v933_v1  ;;  %v924_v63 = vmul.f32 0.125, %v915_v40  ;;  %v947_v9 = vadd.f32 %v946_v56, %v945_v50 }
 0x327   :  { %v909_v10 = vadd.f32 %v908_v57, %v907_v51  ;;  %v940_v11 = vrot.slane %v939_v58, 1  ;;  %v921_v12 = vadd.f32 %v920_v59, %v919_v54  ;;  %v952_v14 = vrot.slane %v951_v60, 1 }
 0x328   :  { %v954_v15 = vmul.f32 0.125, %v935_v62  ;;  %v958_v16 = vmul.f32 %v922_v61, %v922_v61  ;;  %v956_v17 = vmul.f32 0.125, %v947_v9  ;;  %v960_v18 = vmul.f32 %v924_v63, %v924_v63 }
 0x329   :  { %v923_v19 = vmul.f32 0.125, %v909_v10  ;;  %v941_v20 = vadd.f32 %v940_v11, %v939_v58  ;;  %v925_v21 = vmul.f32 0.125, %v921_v12  ;;  %v953_v22 = vadd.f32 %v952_v14, %v951_v60 }
 0x32a   :  { %v962_v23 = vsub.f32 %v954_v15, %v958_v16  ;;  %v964_v24 = vsub.f32 %v956_v17, %v960_v18  ;;  %v5136_v55 = vsub.s32 2, %v5081_v26  ;;  %v5139_v2 = vsub.s32 3, %v5081_v26 }
 0x32b   :  { %v955_v25 = vmul.f32 0.125, %v941_v20  ;;  %v959_v27 = vmul.f32 %v923_v19, %v923_v19  ;;  %v957_v29 = vmul.f32 0.125, %v953_v22  ;;  %v961_v30 = vmul.f32 %v925_v21, %v925_v21 }
 0x32c   :  { %v966_v31 = vmax.f32 %v962_v23, 0.0  ;;  %v968_v32 = vmax.f32 %v964_v24, 0.0 }
 0x32d   :  { %v963_v35 = vsub.f32 %v955_v25, %v959_v27  ;;  %v965_v36 = vsub.f32 %v957_v29, %v961_v30 }
 0x32e   :  { %v970_v38 = vadd.f32 0.8, %v966_v31  ;;  %v972_v39 = vadd.f32 0.8, %v968_v32 }
 0x32f   :  { %v967_v41 = vmax.f32 %v963_v35, 0.0  ;;  %v969_v42 = vmax.f32 %v965_v36, 0.0 }
 0x330   :  { %4739 = vrsqrt.f32 %v970_v38 }
 0x331   :  { %v971_v43 = vadd.f32 0.8, %v967_v41  ;;  %v973_v44 = vadd.f32 0.8, %v969_v42  ;;  %4741 = vrsqrt.f32 %v972_v39 }
 0x333   :  { %4743 = vrsqrt.f32 %v971_v43 }
 0x334   :  { %4745 = vrsqrt.f32 %v973_v44 }
 0x33d   :  { %v4740_v45 = vpop.eup %4739 }
 0x33e   :  { %v4742_v46 = vpop.eup %4741 }
 0x340   :  { %v4744_v47 = vpop.eup %4743 }
 0x341   :  { %v4746_v48 = vpop.eup %4745  ;;  %v982_v1 = vcombine.low %v4740_v45, %v4744_v47 }
 0x342   :  { %v983_v49 = vcombine.low %v4742_v46, %v4746_v48 }
 0x343   :  { %v990_v50 = vrot.slane %v982_v1, %v5084_v28 }
 0x344   :  { %v997_v51 = vrot.slane %v983_v49, %v5084_v28 }
 0x346   :  { %v998_v52 = vcombine.low %v990_v50, %v997_v51 }
 0x348   :  { %v1005_v54 = vrot.slane %v998_v52, %v5084_v28 }
 0x34a   :  { %v1007_v37 = vmul.f32 %v1005_v54, %v5047_v3 }
 0x34c   :  { %v1012_v40 = vrot.slane %v1007_v37, %v5089_v33  ;;  %v1016_v56 = vrot.slane %v1007_v37, %v5092_v34  ;;  %v1020_v57 = vrot.slane %v1007_v37, %v5136_v55  ;;  %v1024_v58 = vrot.slane %v1007_v37, %v5139_v2 }
 0x34e   :  { %v1029_v59 = vmul.f32 %v1012_v40, %v922_v61  ;;  %v1030_v60 = vmul.f32 %v1016_v56, %v923_v19  ;;  %v1031_v62 = vmul.f32 %v1020_v57, %v924_v63  ;;  %v1032_v9 = vmul.f32 %v1024_v58, %v925_v21 }
 0x34f   :  { %v1063_v17 = vmul.f32 %v1012_v40, %v5108_v0  ;;  %v1064_v18 = vmul.f32 %v1016_v56, %v5118_v13  ;;  %v1065_v61 = vmul.f32 %v1020_v57, %v5110_v8  ;;  %v1066_v63 = vmul.f32 %v1024_v58, %v5120_v53 }
 0x350   :  { %v1037_v10 = vcombine.low %v1029_v59, %v1030_v60  ;;  %v1038_v11 = vcombine.low %v1031_v62, %v1032_v9 }
 0x352   :  { %v1045_v12 = vrot.slane %v1037_v10, %v5084_v28  ;;  %v1052_v14 = vrot.slane %v1038_v11, %v5084_v28 }
 0x354   :  { %v1053_v15 = vcombine.low %v1045_v12, %v1052_v14 }
 0x356   :  { %v1060_v3 = vrot.slane %v1053_v15, %v5084_v28 }
 0x358   :  { %v1062_v16 = vsub.f32 %v5049_v4, %v1060_v3 }
 0x35a   :  { %v1071_v19 = vrot.slane %v1062_v16, %v5089_v33  ;;  %v1075_v20 = vrot.slane %v1062_v16, %v5092_v34  ;;  %v1079_v21 = vrot.slane %v1062_v16, %v5136_v55  ;;  %v1083_v22 = vrot.slane %v1062_v16, %v5139_v2 }
 0x35c   :  { %v1088_v23 = vadd.f32 %v1071_v19, %v1063_v17  ;;  %v1089_v24 = vadd.f32 %v1075_v20, %v1064_v18  ;;  %v1090_v25 = vadd.f32 %v1079_v21, %v1065_v61  ;;  %v1091_v4 = vadd.f32 %v1083_v22, %v1066_v63 }
 0x35e   :  { %v1092_v27 = vmul.f32 0.2, %v1088_v23  ;;  %v1093_v0 = vmul.f32 0.2, %v1089_v24  ;;  %v1094_v29 = vmul.f32 0.2, %v1090_v25 }
 0x35f   :  { %v1095_v13 = vmul.f32 0.2, %v1091_v4 }
 0x360   :  { %v5158_v30 = vmax.f32 %v1088_v23, %v1092_v27  ;;  %v1097_v8 = vmax.f32 %v1089_v24, %v1093_v0  ;;  %v5160_v53 = vmax.f32 %v1090_v25, %v1094_v29 }
 0x361   :  { %v1099_v31 = vmax.f32 %v1091_v4, %v1095_v13 }
 0x362   :  { %4977 = dma.done.wait [#allocation6 + $0x2], 32768 }
 0x363   :  { %4978 = vsyncadd [#allocation6 + $0x2], 4294934528  ;;  %v5162_v32 = vpack.c.bf16 %v1097_v8, %v1097_v8  ;;  %v5164_v35 = vpack.c.bf16 %v1099_v31, %v1099_v31  ;;  %v1160_v36 = vld [vmem:[#allocation4 + $0x1c0] sm:$0xff] }
 0x364   :  { %v1164_v38 = vld [vmem:[#allocation4 + $0x1e0] sm:$0xff] }
 0x365   :  { %2676 = vmatprep.mubr.bf16.mxu0 %v5162_v32  ;;  %2717 = vmatprep.mubr.bf16.mxu1 %v5164_v35  ;;  %v1288_v39 = vld [vmem:[#allocation4 + $0x5c0] sm:$0xff]  ;;  %v4237_v41 = vcombine.high %v1160_v36, %v1164_v38  ;;  %v4236_v43 = vcombine.low %v1160_v36, %v1164_v38 }
 0x366   :  { %v1292_v42 = vld [vmem:[#allocation4 + $0x5e0] sm:$0xff] }
 0x367   :  { %v1152_v44 = vld [vmem:[#allocation4 + $0x180] sm:$0xff]  ;;  %v4365_v46 = vcombine.high %v1288_v39, %v1292_v42  ;;  %v4364_v47 = vcombine.low %v1288_v39, %v1292_v42  ;;  %2644 = vmatprep.subr.bf16.mxu0 %v4237_v41 }
 0x368   :  { %v1156_v45 = vld [vmem:[#allocation4 + $0x1a0] sm:$0xff]  ;;  %2645 = vmatpush1.bf16.msra.mxu0 %v4236_v43 }
 0x369   :  { %v4229_v48 = vcombine.high %v1152_v44, %v1156_v45  ;;  %v1280_v1 = vld [vmem:[#allocation4 + $0x580] sm:$0xff]  ;;  %2685 = vmatprep.subr.bf16.mxu1 %v4365_v46  ;;  %v4228_v40 = vcombine.low %v1152_v44, %v1156_v45 }
 0x36a   :  { %v1284_v49 = vld [vmem:[#allocation4 + $0x5a0] sm:$0xff]  ;;  %2686 = vmatpush1.bf16.msra.mxu1 %v4364_v47 }
 0x36b   :  { %v1144_v50 = vld [vmem:[#allocation4 + $0x140] sm:$0xff]  ;;  %v4357_v51 = vcombine.high %v1280_v1, %v1284_v49  ;;  %2646 = vmatprep.subr.bf16.mxu0 %v4229_v48  ;;  %v4356_v56 = vcombine.low %v1280_v1, %v1284_v49 }
 0x36c   :  { %v1148_v52 = vld [vmem:[#allocation4 + $0x160] sm:$0xff]  ;;  %2647 = vmatpush1.bf16.msra.mxu0 %v4228_v40 }
 0x36d   :  { %v1272_v54 = vld [vmem:[#allocation4 + $0x540] sm:$0xff]  ;;  %v4221_v57 = vcombine.high %v1144_v50, %v1148_v52  ;;  %2687 = vmatprep.subr.bf16.mxu1 %v4357_v51  ;;  %v4220_v10 = vcombine.low %v1144_v50, %v1148_v52 }
 0x36e   :  { %v1276_v37 = vld [vmem:[#allocation4 + $0x560] sm:$0xff]  ;;  %2688 = vmatpush1.bf16.msra.mxu1 %v4356_v56 }
 0x36f   :  { %v4349_v58 = vcombine.high %v1272_v54, %v1276_v37  ;;  %v1136_v59 = vld [vmem:[#allocation4 + $0x100] sm:$0xff]  ;;  %2648 = vmatprep.subr.bf16.mxu0 %v4221_v57  ;;  %v4348_v11 = vcombine.low %v1272_v54, %v1276_v37 }
 0x370   :  { %v1140_v60 = vld [vmem:[#allocation4 + $0x120] sm:$0xff]  ;;  %2649 = vmatpush1.bf16.msra.mxu0 %v4220_v10 }
 0x371   :  { %v1264_v62 = vld [vmem:[#allocation4 + $0x500] sm:$0xff]  ;;  %v4213_v12 = vcombine.high %v1136_v59, %v1140_v60  ;;  %2689 = vmatprep.subr.bf16.mxu1 %v4349_v58  ;;  %v4212_v18 = vcombine.low %v1136_v59, %v1140_v60 }
 0x372   :  { %v1268_v9 = vld [vmem:[#allocation4 + $0x520] sm:$0xff]  ;;  %2690 = vmatpush1.bf16.msra.mxu1 %v4348_v11 }
 0x373   :  { %v4341_v14 = vcombine.high %v1264_v62, %v1268_v9  ;;  %v1128_v15 = vld [vmem:[#allocation4 + $0xc0] sm:$0xff]  ;;  %2650 = vmatprep.subr.bf16.mxu0 %v4213_v12  ;;  %v4340_v61 = vcombine.low %v1264_v62, %v1268_v9 }
 0x374   :  { %v1132_v3 = vld [vmem:[#allocation4 + $0xe0] sm:$0xff]  ;;  %2651 = vmatpush1.bf16.msra.mxu0 %v4212_v18 }
 0x375   :  { %v1256_v16 = vld [vmem:[#allocation4 + $0x4c0] sm:$0xff]  ;;  %v4205_v63 = vcombine.high %v1128_v15, %v1132_v3  ;;  %2691 = vmatprep.subr.bf16.mxu1 %v4341_v14  ;;  %v4204_v24 = vcombine.low %v1128_v15, %v1132_v3 }
 0x376   :  { %v1260_v17 = vld [vmem:[#allocation4 + $0x4e0] sm:$0xff]  ;;  %2692 = vmatpush1.bf16.msra.mxu1 %v4340_v61 }
 0x377   :  { %v4333_v19 = vcombine.high %v1256_v16, %v1260_v17  ;;  %v1120_v20 = vld [vmem:[#allocation4 + $0x80] sm:$0xff]  ;;  %2652 = vmatprep.subr.bf16.mxu0 %v4205_v63  ;;  %v4332_v25 = vcombine.low %v1256_v16, %v1260_v17 }
 0x378   :  { %v1124_v21 = vld [vmem:[#allocation4 + $0xa0] sm:$0xff]  ;;  %2653 = vmatpush1.bf16.msra.mxu0 %v4204_v24 }
 0x379   :  { %v1248_v22 = vld [vmem:[#allocation4 + $0x480] sm:$0xff]  ;;  %v4197_v4 = vcombine.high %v1120_v20, %v1124_v21  ;;  %2693 = vmatprep.subr.bf16.mxu1 %v4333_v19  ;;  %v4196_v31 = vcombine.low %v1120_v20, %v1124_v21 }
 0x37a   :  { %v1252_v23 = vld [vmem:[#allocation4 + $0x4a0] sm:$0xff]  ;;  %2694 = vmatpush1.bf16.msra.mxu1 %v4332_v25 }
 0x37b   :  { %v4325_v27 = vcombine.high %v1248_v22, %v1252_v23  ;;  %v1112_v0 = vld [vmem:[#allocation4 + $0x40] sm:$0xff]  ;;  %2654 = vmatprep.subr.bf16.mxu0 %v4197_v4  ;;  %v4324_v36 = vcombine.low %v1248_v22, %v1252_v23 }
 0x37c   :  { %v1116_v29 = vld [vmem:[#allocation4 + $0x60] sm:$0xff]  ;;  %2655 = vmatpush1.bf16.msra.mxu0 %v4196_v31 }
 0x37d   :  { %v1240_v13 = vld [vmem:[#allocation4 + $0x440] sm:$0xff]  ;;  %v4189_v38 = vcombine.high %v1112_v0, %v1116_v29  ;;  %2695 = vmatprep.subr.bf16.mxu1 %v4325_v27  ;;  %v4188_v45 = vcombine.low %v1112_v0, %v1116_v29 }
 0x37e   :  { %v1244_v8 = vld [vmem:[#allocation4 + $0x460] sm:$0xff]  ;;  %2696 = vmatpush1.bf16.msra.mxu1 %v4324_v36 }
 0x37f   :  { %v4317_v39 = vcombine.high %v1240_v13, %v1244_v8  ;;  %v1104_v41 = vld [vmem:[#allocation4] sm:$0xff]  ;;  %2656 = vmatprep.subr.bf16.mxu0 %v4189_v38  ;;  %v4316_v46 = vcombine.low %v1240_v13, %v1244_v8 }
 0x380   :  { %v1108_v42 = vld [vmem:[#allocation4 + $0x20] sm:$0xff]  ;;  %2657 = vmatpush1.bf16.msra.mxu0 %v4188_v45 }
 0x381   :  { %v1232_v43 = vld [vmem:[#allocation4 + $0x400] sm:$0xff]  ;;  %v4181_v47 = vcombine.high %v1104_v41, %v1108_v42  ;;  %2697 = vmatprep.subr.bf16.mxu1 %v4317_v39  ;;  %v4180_v52 = vcombine.low %v1104_v41, %v1108_v42 }
 0x382   :  { %v1236_v44 = vld [vmem:[#allocation4 + $0x420] sm:$0xff]  ;;  %2698 = vmatpush1.bf16.msra.mxu1 %v4316_v46 }
 0x383   :  { %v4309_v48 = vcombine.high %v1232_v43, %v1236_v44  ;;  %v1224_v1 = vld [vmem:[#allocation4 + $0x3c0] sm:$0xff]  ;;  %2658 = vmatprep.subr.bf16.mxu0 %v4181_v47  ;;  %v4308_v54 = vcombine.low %v1232_v43, %v1236_v44 }
 0x384   :  { %v1228_v49 = vld [vmem:[#allocation4 + $0x3e0] sm:$0xff]  ;;  %2659 = vmatpush1.bf16.msra.mxu0 %v4180_v52 }
 0x385   :  { %v1352_v50 = vld [vmem:[#allocation4 + $0x7c0] sm:$0xff]  ;;  %v4301_v37 = vcombine.high %v1224_v1, %v1228_v49  ;;  %2699 = vmatprep.subr.bf16.mxu1 %v4309_v48  ;;  %v4300_v60 = vcombine.low %v1224_v1, %v1228_v49 }
 0x386   :  { %v1356_v51 = vld [vmem:[#allocation4 + $0x7e0] sm:$0xff]  ;;  %2700 = vmatpush1.bf16.msra.mxu1 %v4308_v54 }
 0x387   :  { %v4429_v40 = vcombine.high %v1352_v50, %v1356_v51  ;;  %v1216_v56 = vld [vmem:[#allocation4 + $0x380] sm:$0xff]  ;;  %2660 = vmatprep.subr.bf16.mxu0 %v4301_v37  ;;  %v4428_v62 = vcombine.low %v1352_v50, %v1356_v51 }
 0x388   :  { %v1220_v57 = vld [vmem:[#allocation4 + $0x3a0] sm:$0xff]  ;;  %2661 = vmatpush2.bf16.msra.mxu0 %v4300_v60 }
 0x389   :  { %v1344_v58 = vld [vmem:[#allocation4 + $0x780] sm:$0xff]  ;;  %v4293_v9 = vcombine.high %v1216_v56, %v1220_v57  ;;  %2701 = vmatprep.subr.bf16.mxu1 %v4429_v40  ;;  %v4292_v3 = vcombine.low %v1216_v56, %v1220_v57 }
 0x38a   :  { %v1348_v59 = vld [vmem:[#allocation4 + $0x7a0] sm:$0xff]  ;;  %2702 = vmatpush2.bf16.msra.mxu1 %v4428_v62  ;;  %v1161_v62 = vld [vmem:[#allocation4 + $0x1c8] sm:$0xff] }
 0x38b   :  { %v4421_v10 = vcombine.high %v1344_v58, %v1348_v59  ;;  %v1208_v11 = vld [vmem:[#allocation4 + $0x340] sm:$0xff]  ;;  %2662 = vmatprep.subr.bf16.mxu0 %v4293_v9  ;;  %v4420_v16 = vcombine.low %v1344_v58, %v1348_v59  ;;  %v1165_v9 = vld [vmem:[#allocation4 + $0x1e8] sm:$0xff] }
 0x38c   :  { %v1212_v12 = vld [vmem:[#allocation4 + $0x360] sm:$0xff]  ;;  %2663 = vmatpush2.bf16.msra.mxu0 %v4292_v3 }
 0x38d   :  { %v1336_v14 = vld [vmem:[#allocation4 + $0x740] sm:$0xff]  ;;  %v4285_v17 = vcombine.high %v1208_v11, %v1212_v12  ;;  %2703 = vmatprep.subr.bf16.mxu1 %v4421_v10  ;;  %v4284_v21 = vcombine.low %v1208_v11, %v1212_v12  ;;  %v1289_v10 = vld [vmem:[#allocation4 + $0x5c8] sm:$0xff] }
 0x38e   :  { %v1340_v15 = vld [vmem:[#allocation4 + $0x760] sm:$0xff]  ;;  %2704 = vmatpush2.bf16.msra.mxu1 %v4420_v16  ;;  %v1293_v11 = vld [vmem:[#allocation4 + $0x5e8] sm:$0xff] }
 0x38f   :  { %v4413_v18 = vcombine.high %v1336_v14, %v1340_v15  ;;  %v1200_v61 = vld [vmem:[#allocation4 + $0x300] sm:$0xff]  ;;  %2664 = vmatprep.subr.bf16.mxu0 %v4285_v17  ;;  %v4412_v22 = vcombine.low %v1336_v14, %v1340_v15  ;;  %v4239_v15 = vcombine.high %v1161_v62, %v1165_v9  ;;  %v4367_v3 = vcombine.high %v1289_v10, %v1293_v11  ;;  %v1153_v16 = vld [vmem:[#allocation4 + $0x188] sm:$0xff] }
 0x390   :  { %v1204_v63 = vld [vmem:[#allocation4 + $0x320] sm:$0xff]  ;;  %2665 = vmatpush2.bf16.msra.mxu0 %v4284_v21  ;;  %v1157_v17 = vld [vmem:[#allocation4 + $0x1a8] sm:$0xff]  ;;  %v4366_v21 = vcombine.low %v1289_v10, %v1293_v11 }
 0x391   :  { %v1328_v19 = vld [vmem:[#allocation4 + $0x700] sm:$0xff]  ;;  %v4277_v23 = vcombine.high %v1200_v61, %v1204_v63  ;;  %2705 = vmatprep.subr.bf16.mxu1 %v4413_v18  ;;  %v4276_v29 = vcombine.low %v1200_v61, %v1204_v63  ;;  %v5170_v18 = vpack.c.bf16 %v5158_v30, %v5158_v30  ;;  %v1281_v61 = vld [vmem:[#allocation4 + $0x588] sm:$0xff] }
 0x392   :  { %v1332_v20 = vld [vmem:[#allocation4 + $0x720] sm:$0xff]  ;;  %2706 = vmatpush2.bf16.msra.mxu1 %v4412_v22  ;;  %v1285_v63 = vld [vmem:[#allocation4 + $0x5a8] sm:$0xff]  ;;  %v4231_v22 = vcombine.high %v1153_v16, %v1157_v17 }
 0x393   :  { %v4405_v24 = vcombine.high %v1328_v19, %v1332_v20  ;;  %v1192_v25 = vld [vmem:[#allocation4 + $0x2c0] sm:$0xff]  ;;  %2666 = vmatprep.subr.bf16.mxu0 %v4277_v23  ;;  %v4404_v13 = vcombine.low %v1328_v19, %v1332_v20  ;;  %v5174_v19 = vpack.c.bf16 %v5160_v53, %v5160_v53  ;;  %v4238_v20 = vcombine.low %v1161_v62, %v1165_v9  ;;  %v1273_v30 = vld [vmem:[#allocation4 + $0x548] sm:$0xff] }
 0x394   :  { %v1196_v4 = vld [vmem:[#allocation4 + $0x2e0] sm:$0xff]  ;;  %2667 = vmatpush2.bf16.msra.mxu0 %v4276_v29  ;;  %v4359_v23 = vcombine.high %v1281_v61, %v1285_v63  ;;  %v4358_v53 = vcombine.low %v1281_v61, %v1285_v63  ;;  %v1245_v62 = vld [vmem:[#allocation4 + $0x468] sm:$0xff] }
 0x395   :  { %v1320_v27 = vld [vmem:[#allocation4 + $0x6c0] sm:$0xff]  ;;  %v4269_v8 = vcombine.high %v1192_v25, %v1196_v4  ;;  %2707 = vmatprep.subr.bf16.mxu1 %v4405_v24  ;;  %v4268_v42 = vcombine.low %v1192_v25, %v1196_v4  ;;  %v1145_v24 = vld [vmem:[#allocation4 + $0x148] sm:$0xff] }
 0x396   :  { %v1324_v0 = vld [vmem:[#allocation4 + $0x6e0] sm:$0xff]  ;;  %2708 = vmatpush2.bf16.msra.mxu1 %v4404_v13  ;;  %v1149_v25 = vld [vmem:[#allocation4 + $0x168] sm:$0xff] }
 0x397   :  { %v4397_v31 = vcombine.high %v1320_v27, %v1324_v0  ;;  %v1184_v36 = vld [vmem:[#allocation4 + $0x280] sm:$0xff]  ;;  %2668 = vmatprep.subr.bf16.mxu0 %v4269_v8  ;;  %v4396_v43 = vcombine.low %v1320_v27, %v1324_v0  ;;  %v1277_v4 = vld [vmem:[#allocation4 + $0x568] sm:$0xff]  ;;  %v4230_v27 = vcombine.low %v1153_v16, %v1157_v17  ;;  %v4223_v0 = vcombine.high %v1145_v24, %v1149_v25 }
 0x398   :  { %v1188_v38 = vld [vmem:[#allocation4 + $0x2a0] sm:$0xff]  ;;  %2669 = vmatpush2.bf16.msra.mxu0 %v4268_v42  ;;  %v4351_v29 = vcombine.high %v1273_v30, %v1277_v4  ;;  %v1137_v13 = vld [vmem:[#allocation4 + $0x108] sm:$0xff] }
 0x399   :  { %v1312_v39 = vld [vmem:[#allocation4 + $0x680] sm:$0xff]  ;;  %v4261_v44 = vcombine.high %v1184_v36, %v1188_v38  ;;  %2709 = vmatprep.subr.bf16.mxu1 %v4397_v31  ;;  %v4260_v49 = vcombine.low %v1184_v36, %v1188_v38  ;;  %v1141_v8 = vld [vmem:[#allocation4 + $0x128] sm:$0xff]  ;;  %v4222_v38 = vcombine.low %v1145_v24, %v1149_v25 }
 0x39a   :  { %v1316_v41 = vld [vmem:[#allocation4 + $0x6a0] sm:$0xff]  ;;  %2710 = vmatpush2.bf16.msra.mxu1 %v4396_v43  ;;  %v1265_v31 = vld [vmem:[#allocation4 + $0x508] sm:$0xff] }
 0x39b   :  { %v4389_v45 = vcombine.high %v1312_v39, %v1316_v41  ;;  %v1176_v46 = vld [vmem:[#allocation4 + $0x240] sm:$0xff]  ;;  %2670 = vmatprep.subr.bf16.mxu0 %v4261_v44  ;;  %v4388_v50 = vcombine.low %v1312_v39, %v1316_v41  ;;  %v1269_v36 = vld [vmem:[#allocation4 + $0x528] sm:$0xff]  ;;  %v4350_v39 = vcombine.low %v1273_v30, %v1277_v4  ;;  %v4215_v41 = vcombine.high %v1137_v13, %v1141_v8 }
 0x39c   :  { %v1180_v47 = vld [vmem:[#allocation4 + $0x260] sm:$0xff]  ;;  %2671 = vmatpush2.bf16.msra.mxu0 %v4260_v49  ;;  %v4343_v42 = vcombine.high %v1265_v31, %v1269_v36  ;;  %v1129_v43 = vld [vmem:[#allocation4 + $0xc8] sm:$0xff] }
 0x39d   :  { %v1304_v48 = vld [vmem:[#allocation4 + $0x640] sm:$0xff]  ;;  %v4253_v51 = vcombine.high %v1176_v46, %v1180_v47  ;;  %2711 = vmatprep.subr.bf16.mxu1 %v4389_v45  ;;  %v4252_v57 = vcombine.low %v1176_v46, %v1180_v47  ;;  %v1133_v44 = vld [vmem:[#allocation4 + $0xe8] sm:$0xff]  ;;  %v4214_v47 = vcombine.low %v1137_v13, %v1141_v8 }
 0x39e   :  { %v1308_v1 = vld [vmem:[#allocation4 + $0x660] sm:$0xff]  ;;  %2712 = vmatpush2.bf16.msra.mxu1 %v4388_v50  ;;  %v1257_v45 = vld [vmem:[#allocation4 + $0x4c8] sm:$0xff] }
 0x39f   :  { %v4381_v52 = vcombine.high %v1304_v48, %v1308_v1  ;;  %v1168_v54 = vld [vmem:[#allocation4 + $0x200] sm:$0xff]  ;;  %2672 = vmatprep.subr.bf16.mxu0 %v4253_v51  ;;  %v4380_v58 = vcombine.low %v1304_v48, %v1308_v1  ;;  %v1261_v46 = vld [vmem:[#allocation4 + $0x4e8] sm:$0xff]  ;;  %v4342_v48 = vcombine.low %v1265_v31, %v1269_v36  ;;  %v4207_v1 = vcombine.high %v1129_v43, %v1133_v44 }
 0x3a0   :  { %v1172_v37 = vld [vmem:[#allocation4 + $0x220] sm:$0xff]  ;;  %2673 = vmatpush2.bf16.msra.mxu0 %v4252_v57  ;;  %v4335_v49 = vcombine.high %v1257_v45, %v1261_v46  ;;  %v1121_v50 = vld [vmem:[#allocation4 + $0x88] sm:$0xff] }
 0x3a1   :  { %v1296_v40 = vld [vmem:[#allocation4 + $0x600] sm:$0xff]  ;;  %v4245_v59 = vcombine.high %v1168_v54, %v1172_v37  ;;  %2713 = vmatprep.subr.bf16.mxu1 %v4381_v52  ;;  %v4244_v12 = vcombine.low %v1168_v54, %v1172_v37  ;;  %v1125_v51 = vld [vmem:[#allocation4 + $0xa8] sm:$0xff]  ;;  %v4206_v37 = vcombine.low %v1129_v43, %v1133_v44 }
 0x3a2   :  { %v1300_v56 = vld [vmem:[#allocation4 + $0x620] sm:$0xff]  ;;  %2714 = vmatpush2.bf16.msra.mxu1 %v4380_v58  ;;  %v1249_v52 = vld [vmem:[#allocation4 + $0x488] sm:$0xff]  ;;  %v4198_v9 = vcombine.low %v1121_v50, %v1125_v51 }
 0x3a3   :  { %v4373_v60 = vcombine.high %v1296_v40, %v1300_v56  ;;  %2674 = vmatprep.subr.bf16.mxu0 %v4245_v59  ;;  %v4372_v14 = vcombine.low %v1296_v40, %v1300_v56  ;;  %v1253_v54 = vld [vmem:[#allocation4 + $0x4a8] sm:$0xff]  ;;  %v4334_v40 = vcombine.low %v1257_v45, %v1261_v46  ;;  %v4199_v56 = vcombine.high %v1121_v50, %v1125_v51 }
 0x3a4   :  { %2675 = vmatpush2.bf16.msra.mxu0 %v4244_v12  ;;  %v4327_v57 = vcombine.high %v1249_v52, %v1253_v54  ;;  %v1113_v58 = vld [vmem:[#allocation4 + $0x48] sm:$0xff]  ;;  %v4326_v10 = vcombine.low %v1249_v52, %v1253_v54 }
 0x3a5   :  { %2715 = vmatprep.subr.bf16.mxu1 %v4373_v60  ;;  %2726 = vmatprep.subr.bf16.mxu0 %v4239_v15  ;;  %v1117_v59 = vld [vmem:[#allocation4 + $0x68] sm:$0xff] }
 0x3a6   :  { %2716 = vmatpush2.bf16.msra.mxu1 %v4372_v14  ;;  %v1241_v60 = vld [vmem:[#allocation4 + $0x448] sm:$0xff]  ;;  %v4191_v11 = vcombine.high %v1113_v58, %v1117_v59  ;;  %v4190_v17 = vcombine.low %v1113_v58, %v1117_v59 }
 0x3a7   :  { %2767 = vmatprep.subr.bf16.mxu1 %v4367_v3  ;;  %2677 = vmatmul.mubr.bf16.vlgmr.msra.gmra.mxu0 %v5170_v18  ;;  %v4319_v12 = vcombine.high %v1241_v60, %v1245_v62  ;;  %v1105_v14 = vld [vmem:[#allocation4 + $0x8] sm:$0xff]  ;;  %v4318_v61 = vcombine.low %v1241_v60, %v1245_v62 }
 0x3a8   :  { %2727 = vmatpush1.bf16.msra.mxu0 %v4238_v20  ;;  %2758 = vmatprep.mubr.bf16.mxu0 %v5162_v32  ;;  %v1109_v15 = vld [vmem:[#allocation4 + $0x28] sm:$0xff] }
 0x3a9   :  { %2718 = vmatmul.mubr.bf16.vlgmr.msra.gmra.mxu1 %v5174_v19  ;;  %2728 = vmatprep.subr.bf16.mxu0 %v4231_v22  ;;  %v1233_v3 = vld [vmem:[#allocation4 + $0x408] sm:$0xff]  ;;  %v4183_v63 = vcombine.high %v1105_v14, %v1109_v15  ;;  %v4182_v25 = vcombine.low %v1105_v14, %v1109_v15 }
 0x3aa   :  { %2768 = vmatpush1.bf16.msra.mxu1 %v4366_v21  ;;  %2799 = vmatprep.mubr.bf16.mxu1 %v5164_v35  ;;  %v1237_v16 = vld [vmem:[#allocation4 + $0x428] sm:$0xff] }
 0x3ab   :  { %2769 = vmatprep.subr.bf16.mxu1 %v4359_v23  ;;  %v4311_v20 = vcombine.high %v1233_v3, %v1237_v16  ;;  %v1225_v21 = vld [vmem:[#allocation4 + $0x3c8] sm:$0xff]  ;;  %v4310_v30 = vcombine.low %v1233_v3, %v1237_v16 }
 0x3ac   :  { %2729 = vmatpush1.bf16.msra.mxu0 %v4230_v27  ;;  %v1229_v22 = vld [vmem:[#allocation4 + $0x3e8] sm:$0xff] }
 0x3ad   :  { %2730 = vmatprep.subr.bf16.mxu0 %v4223_v0  ;;  %v1353_v23 = vld [vmem:[#allocation4 + $0x7c8] sm:$0xff]  ;;  %v4303_v4 = vcombine.high %v1225_v21, %v1229_v22  ;;  %v4302_v8 = vcombine.low %v1225_v21, %v1229_v22 }
 0x3ae   :  { %2770 = vmatpush1.bf16.msra.mxu1 %v4358_v53  ;;  %v1357_v24 = vld [vmem:[#allocation4 + $0x7e8] sm:$0xff] }
 0x3af   :  { %2771 = vmatprep.subr.bf16.mxu1 %v4351_v29  ;;  %v4431_v27 = vcombine.high %v1353_v23, %v1357_v24  ;;  %v1217_v53 = vld [vmem:[#allocation4 + $0x388] sm:$0xff]  ;;  %v4430_v31 = vcombine.low %v1353_v23, %v1357_v24 }
 0x3b0   :  { %2731 = vmatpush1.bf16.msra.mxu0 %v4222_v38  ;;  %v1221_v0 = vld [vmem:[#allocation4 + $0x3a8] sm:$0xff] }
 0x3b1   :  { %2732 = vmatprep.subr.bf16.mxu0 %v4215_v41  ;;  %v1345_v29 = vld [vmem:[#allocation4 + $0x788] sm:$0xff]  ;;  %v4295_v36 = vcombine.high %v1217_v53, %v1221_v0  ;;  %v4294_v44 = vcombine.low %v1217_v53, %v1221_v0 }
 0x3b2   :  { %2772 = vmatpush1.bf16.msra.mxu1 %v4350_v39  ;;  %v1349_v13 = vld [vmem:[#allocation4 + $0x7a8] sm:$0xff] }
 0x3b3   :  { %2773 = vmatprep.subr.bf16.mxu1 %v4343_v42  ;;  %v4423_v38 = vcombine.high %v1345_v29, %v1349_v13  ;;  %v1209_v39 = vld [vmem:[#allocation4 + $0x348] sm:$0xff]  ;;  %v4422_v45 = vcombine.low %v1345_v29, %v1349_v13 }
 0x3b4   :  { %2733 = vmatpush1.bf16.msra.mxu0 %v4214_v47  ;;  %v1213_v41 = vld [vmem:[#allocation4 + $0x368] sm:$0xff] }
 0x3b5   :  { %2734 = vmatprep.subr.bf16.mxu0 %v4207_v1  ;;  %v1337_v42 = vld [vmem:[#allocation4 + $0x748] sm:$0xff]  ;;  %v4287_v46 = vcombine.high %v1209_v39, %v1213_v41  ;;  %v4286_v51 = vcombine.low %v1209_v39, %v1213_v41  ;;  %v1294_v39 = vld [vmem:[#allocation4 + $0x5f0] sm:$0xff] }
 0x3b6   :  { %2774 = vmatpush1.bf16.msra.mxu1 %v4342_v48  ;;  %v1341_v43 = vld [vmem:[#allocation4 + $0x768] sm:$0xff] }
 0x3b7   :  { %2775 = vmatprep.subr.bf16.mxu1 %v4335_v49  ;;  %v4415_v47 = vcombine.high %v1337_v42, %v1341_v43  ;;  %v1201_v48 = vld [vmem:[#allocation4 + $0x308] sm:$0xff]  ;;  %v4414_v52 = vcombine.low %v1337_v42, %v1341_v43 }
 0x3b8   :  { %2735 = vmatpush1.bf16.msra.mxu0 %v4206_v37  ;;  %v1205_v1 = vld [vmem:[#allocation4 + $0x328] sm:$0xff] }
 0x3b9   :  { %2736 = vmatprep.subr.bf16.mxu0 %v4199_v56  ;;  %v1329_v49 = vld [vmem:[#allocation4 + $0x708] sm:$0xff]  ;;  %v4279_v54 = vcombine.high %v1201_v48, %v1205_v1  ;;  %v4278_v59 = vcombine.low %v1201_v48, %v1205_v1  ;;  %v1286_v48 = vld [vmem:[#allocation4 + $0x5b0] sm:$0xff] }
 0x3ba   :  { %2776 = vmatpush1.bf16.msra.mxu1 %v4334_v40  ;;  %v1333_v50 = vld [vmem:[#allocation4 + $0x728] sm:$0xff] }
 0x3bb   :  { %2777 = vmatprep.subr.bf16.mxu1 %v4327_v57  ;;  %v4407_v37 = vcombine.high %v1329_v49, %v1333_v50  ;;  %v1193_v40 = vld [vmem:[#allocation4 + $0x2c8] sm:$0xff]  ;;  %v4406_v60 = vcombine.low %v1329_v49, %v1333_v50 }
 0x3bc   :  { %2737 = vmatpush1.bf16.msra.mxu0 %v4198_v9  ;;  %v1197_v56 = vld [vmem:[#allocation4 + $0x2e8] sm:$0xff] }
 0x3bd   :  { %2738 = vmatprep.subr.bf16.mxu0 %v4191_v11  ;;  %v1321_v57 = vld [vmem:[#allocation4 + $0x6c8] sm:$0xff]  ;;  %v4271_v62 = vcombine.high %v1193_v40, %v1197_v56  ;;  %v4270_v15 = vcombine.low %v1193_v40, %v1197_v56  ;;  %v1278_v40 = vld [vmem:[#allocation4 + $0x570] sm:$0xff] }
 0x3be   :  { %2778 = vmatpush1.bf16.msra.mxu1 %v4326_v10  ;;  %v1325_v58 = vld [vmem:[#allocation4 + $0x6e8] sm:$0xff] }
 0x3bf   :  { %2779 = vmatprep.subr.bf16.mxu1 %v4319_v12  ;;  %v4399_v9 = vcombine.high %v1321_v57, %v1325_v58  ;;  %v1185_v10 = vld [vmem:[#allocation4 + $0x288] sm:$0xff]  ;;  %v4398_v3 = vcombine.low %v1321_v57, %v1325_v58 }
 0x3c0   :  { %2739 = vmatpush1.bf16.msra.mxu0 %v4190_v17  ;;  %v1189_v11 = vld [vmem:[#allocation4 + $0x2a8] sm:$0xff] }
 0x3c1   :  { %2740 = vmatprep.subr.bf16.mxu0 %v4183_v63  ;;  %v1313_v12 = vld [vmem:[#allocation4 + $0x688] sm:$0xff]  ;;  %v4263_v16 = vcombine.high %v1185_v10, %v1189_v11  ;;  %v4262_v22 = vcombine.low %v1185_v10, %v1189_v11  ;;  %v1270_v10 = vld [vmem:[#allocation4 + $0x530] sm:$0xff] }
 0x3c2   :  { %2780 = vmatpush1.bf16.msra.mxu1 %v4318_v61  ;;  %v1317_v14 = vld [vmem:[#allocation4 + $0x6a8] sm:$0xff] }
 0x3c3   :  { %2781 = vmatprep.subr.bf16.mxu1 %v4311_v20  ;;  %v4391_v17 = vcombine.high %v1313_v12, %v1317_v14  ;;  %v1177_v61 = vld [vmem:[#allocation4 + $0x248] sm:$0xff]  ;;  %v4390_v23 = vcombine.low %v1313_v12, %v1317_v14 }
 0x3c4   :  { %2741 = vmatpush1.bf16.msra.mxu0 %v4182_v25  ;;  %v1181_v63 = vld [vmem:[#allocation4 + $0x268] sm:$0xff] }
 0x3c5   :  { %2742 = vmatprep.subr.bf16.mxu0 %v4303_v4  ;;  %v1305_v20 = vld [vmem:[#allocation4 + $0x648] sm:$0xff]  ;;  %v4255_v24 = vcombine.high %v1177_v61, %v1181_v63  ;;  %v4254_v0 = vcombine.low %v1177_v61, %v1181_v63  ;;  %v1262_v61 = vld [vmem:[#allocation4 + $0x4f0] sm:$0xff] }
 0x3c6   :  { %2782 = vmatpush1.bf16.msra.mxu1 %v4310_v30  ;;  %v1309_v21 = vld [vmem:[#allocation4 + $0x668] sm:$0xff] }
 0x3c7   :  { %2783 = vmatprep.subr.bf16.mxu1 %v4431_v27  ;;  %v4383_v25 = vcombine.high %v1305_v20, %v1309_v21  ;;  %v1169_v30 = vld [vmem:[#allocation4 + $0x208] sm:$0xff]  ;;  %v4382_v29 = vcombine.low %v1305_v20, %v1309_v21 }
 0x3c8   :  { %2743 = vmatpush2.bf16.msra.mxu0 %v4302_v8  ;;  %v1173_v4 = vld [vmem:[#allocation4 + $0x228] sm:$0xff] }
 0x3c9   :  { %2744 = vmatprep.subr.bf16.mxu0 %v4295_v36  ;;  %v1297_v27 = vld [vmem:[#allocation4 + $0x608] sm:$0xff]  ;;  %v4247_v13 = vcombine.high %v1169_v30, %v1173_v4  ;;  %v1166_v36 = vld [vmem:[#allocation4 + $0x1f0] sm:$0xff]  ;;  %v4246_v41 = vcombine.low %v1169_v30, %v1173_v4 }
 0x3ca   :  { %2784 = vmatpush2.bf16.msra.mxu1 %v4430_v31  ;;  %v1301_v53 = vld [vmem:[#allocation4 + $0x628] sm:$0xff]  ;;  %v1162_v31 = vld [vmem:[#allocation4 + $0x1d0] sm:$0xff] }
 0x3cb   :  { %2785 = vmatprep.subr.bf16.mxu1 %v4423_v38  ;;  %v4375_v8 = vcombine.high %v1297_v27, %v1301_v53  ;;  %v1290_v38 = vld [vmem:[#allocation4 + $0x5d0] sm:$0xff]  ;;  %v4374_v42 = vcombine.low %v1297_v27, %v1301_v53  ;;  %v4241_v43 = vcombine.high %v1162_v31, %v1166_v36  ;;  %v4240_v1 = vcombine.low %v1162_v31, %v1166_v36 }
 0x3cc   :  { %2745 = vmatpush2.bf16.msra.mxu0 %v4294_v44  ;;  %v4369_v44 = vcombine.high %v1290_v38, %v1294_v39  ;;  %v4368_v49 = vcombine.low %v1290_v38, %v1294_v39  ;;  %v1254_v30 = vld [vmem:[#allocation4 + $0x4b0] sm:$0xff] }
 0x3cd   :  { %2746 = vmatprep.subr.bf16.mxu0 %v4287_v46  ;;  %v1158_v46 = vld [vmem:[#allocation4 + $0x1b0] sm:$0xff] }
 0x3ce   :  { %2786 = vmatpush2.bf16.msra.mxu1 %v4422_v45  ;;  %v1154_v45 = vld [vmem:[#allocation4 + $0x190] sm:$0xff] }
 0x3cf   :  { %2787 = vmatprep.subr.bf16.mxu1 %v4415_v47  ;;  %v1282_v47 = vld [vmem:[#allocation4 + $0x590] sm:$0xff]  ;;  %v4233_v50 = vcombine.high %v1154_v45, %v1158_v46  ;;  %v4232_v56 = vcombine.low %v1154_v45, %v1158_v46 }
 0x3d0   :  { %2747 = vmatpush2.bf16.msra.mxu0 %v4286_v51  ;;  %v4361_v51 = vcombine.high %v1282_v47, %v1286_v48  ;;  %v4360_v57 = vcombine.low %v1282_v47, %v1286_v48  ;;  %v1246_v31 = vld [vmem:[#allocation4 + $0x470] sm:$0xff] }
 0x3d1   :  { %2748 = vmatprep.subr.bf16.mxu0 %v4279_v54  ;;  %v1150_v54 = vld [vmem:[#allocation4 + $0x170] sm:$0xff] }
 0x3d2   :  { %2788 = vmatpush2.bf16.msra.mxu1 %v4414_v52  ;;  %v1146_v52 = vld [vmem:[#allocation4 + $0x150] sm:$0xff] }
 0x3d3   :  { %2789 = vmatprep.subr.bf16.mxu1 %v4407_v37  ;;  %v1274_v37 = vld [vmem:[#allocation4 + $0x550] sm:$0xff]  ;;  %v4225_v58 = vcombine.high %v1146_v52, %v1150_v54  ;;  %v4224_v11 = vcombine.low %v1146_v52, %v1150_v54 }
 0x3d4   :  { %2749 = vmatpush2.bf16.msra.mxu0 %v4278_v59  ;;  %v4353_v59 = vcombine.high %v1274_v37, %v1278_v40  ;;  %v4352_v12 = vcombine.low %v1274_v37, %v1278_v40  ;;  %v1238_v45 = vld [vmem:[#allocation4 + $0x430] sm:$0xff] }
 0x3d5   :  { %2750 = vmatprep.subr.bf16.mxu0 %v4271_v62  ;;  %v1142_v62 = vld [vmem:[#allocation4 + $0x130] sm:$0xff] }
 0x3d6   :  { %2790 = vmatpush2.bf16.msra.mxu1 %v4406_v60  ;;  %v1138_v60 = vld [vmem:[#allocation4 + $0x110] sm:$0xff] }
 0x3d7   :  { %2791 = vmatprep.subr.bf16.mxu1 %v4399_v9  ;;  %v1266_v9 = vld [vmem:[#allocation4 + $0x510] sm:$0xff]  ;;  %v4217_v14 = vcombine.high %v1138_v60, %v1142_v62  ;;  %v4216_v63 = vcombine.low %v1138_v60, %v1142_v62 }
 0x3d8   :  { %2751 = vmatpush2.bf16.msra.mxu0 %v4270_v15  ;;  %v4345_v15 = vcombine.high %v1266_v9, %v1270_v10  ;;  %v4344_v20 = vcombine.low %v1266_v9, %v1270_v10  ;;  %v1358_v52 = vld [vmem:[#allocation4 + $0x7f0] sm:$0xff] }
 0x3d9   :  { %2752 = vmatprep.subr.bf16.mxu0 %v4263_v16  ;;  %v1134_v16 = vld [vmem:[#allocation4 + $0xf0] sm:$0xff] }
 0x3da   :  { %2792 = vmatpush2.bf16.msra.mxu1 %v4398_v3  ;;  %v1130_v3 = vld [vmem:[#allocation4 + $0xd0] sm:$0xff] }
 0x3db   :  { %2793 = vmatprep.subr.bf16.mxu1 %v4391_v17  ;;  %v1258_v17 = vld [vmem:[#allocation4 + $0x4d0] sm:$0xff]  ;;  %v4209_v21 = vcombine.high %v1130_v3, %v1134_v16  ;;  %v4208_v4 = vcombine.low %v1130_v3, %v1134_v16 }
 0x3dc   :  { %2753 = vmatpush2.bf16.msra.mxu0 %v4262_v22  ;;  %v4337_v22 = vcombine.high %v1258_v17, %v1262_v61  ;;  %v4336_v27 = vcombine.low %v1258_v17, %v1262_v61  ;;  %v1350_v60 = vld [vmem:[#allocation4 + $0x7b0] sm:$0xff] }
 0x3dd   :  { %2754 = vmatprep.subr.bf16.mxu0 %v4255_v24  ;;  %v1126_v24 = vld [vmem:[#allocation4 + $0xb0] sm:$0xff] }
 0x3de   :  { %2794 = vmatpush2.bf16.msra.mxu1 %v4390_v23  ;;  %v1122_v23 = vld [vmem:[#allocation4 + $0x90] sm:$0xff] }
 0x3df   :  { %2795 = vmatprep.subr.bf16.mxu1 %v4383_v25  ;;  %v1250_v25 = vld [vmem:[#allocation4 + $0x490] sm:$0xff]  ;;  %v4201_v53 = vcombine.high %v1122_v23, %v1126_v24  ;;  %v4200_v36 = vcombine.low %v1122_v23, %v1126_v24 }
 0x3e0   :  { %2755 = vmatpush2.bf16.msra.mxu0 %v4254_v0  ;;  %v4329_v0 = vcombine.high %v1250_v25, %v1254_v30  ;;  %v4328_v38 = vcombine.low %v1250_v25, %v1254_v30  ;;  %v1342_v3 = vld [vmem:[#allocation4 + $0x770] sm:$0xff] }
 0x3e1   :  { %2756 = vmatprep.subr.bf16.mxu0 %v4247_v13  ;;  %v1118_v13 = vld [vmem:[#allocation4 + $0x70] sm:$0xff] }
 0x3e2   :  { %2796 = vmatpush2.bf16.msra.mxu1 %v4382_v29  ;;  %v1114_v29 = vld [vmem:[#allocation4 + $0x50] sm:$0xff] }
 0x3e3   :  { %2797 = vmatprep.subr.bf16.mxu1 %v4375_v8  ;;  %v1242_v8 = vld [vmem:[#allocation4 + $0x450] sm:$0xff]  ;;  %v4193_v39 = vcombine.high %v1114_v29, %v1118_v13  ;;  %v4192_v46 = vcombine.low %v1114_v29, %v1118_v13 }
 0x3e4   :  { %2757 = vmatpush2.bf16.msra.mxu0 %v4246_v41  ;;  %v4321_v41 = vcombine.high %v1242_v8, %v1246_v31  ;;  %v4320_v47 = vcombine.low %v1242_v8, %v1246_v31  ;;  %v1334_v23 = vld [vmem:[#allocation4 + $0x730] sm:$0xff] }
 0x3e5   :  { %2808 = vmatprep.subr.bf16.mxu0 %v4241_v43  ;;  %v1110_v43 = vld [vmem:[#allocation4 + $0x30] sm:$0xff] }
 0x3e6   :  { %2798 = vmatpush2.bf16.msra.mxu1 %v4374_v42  ;;  %v1106_v42 = vld [vmem:[#allocation4 + $0x10] sm:$0xff] }
 0x3e7   :  { %2849 = vmatprep.subr.bf16.mxu1 %v4369_v44  ;;  %2759 = vmatmul.mubr.bf16.vlgmr.msra.gmra.mxu0 %v5170_v18  ;;  %v1234_v44 = vld [vmem:[#allocation4 + $0x410] sm:$0xff]  ;;  %v4185_v48 = vcombine.high %v1106_v42, %v1110_v43  ;;  %v4184_v54 = vcombine.low %v1106_v42, %v1110_v43 }
 0x3e8   :  { %2809 = vmatpush1.bf16.msra.mxu0 %v4240_v1  ;;  %2840 = vmatprep.mubr.bf16.mxu0 %v5162_v32  ;;  %v4313_v1 = vcombine.high %v1234_v44, %v1238_v45  ;;  %v4312_v37 = vcombine.low %v1234_v44, %v1238_v45  ;;  %v1326_v29 = vld [vmem:[#allocation4 + $0x6f0] sm:$0xff] }
 0x3e9   :  { %2800 = vmatmul.mubr.bf16.vlgmr.msra.gmra.mxu1 %v5174_v19  ;;  %2810 = vmatprep.subr.bf16.mxu0 %v4233_v50  ;;  %v1230_v50 = vld [vmem:[#allocation4 + $0x3f0] sm:$0xff] }
 0x3ea   :  { %2850 = vmatpush1.bf16.msra.mxu1 %v4368_v49  ;;  %2881 = vmatprep.mubr.bf16.mxu1 %v5164_v35  ;;  %v1226_v49 = vld [vmem:[#allocation4 + $0x3d0] sm:$0xff] }
 0x3eb   :  { %2851 = vmatprep.subr.bf16.mxu1 %v4361_v51  ;;  %v1354_v51 = vld [vmem:[#allocation4 + $0x7d0] sm:$0xff]  ;;  %v4305_v40 = vcombine.high %v1226_v49, %v1230_v50  ;;  %v4304_v62 = vcombine.low %v1226_v49, %v1230_v50 }
 0x3ec   :  { %2811 = vmatpush1.bf16.msra.mxu0 %v4232_v56  ;;  %v4433_v56 = vcombine.high %v1354_v51, %v1358_v52  ;;  %v4432_v9 = vcombine.low %v1354_v51, %v1358_v52  ;;  %v1318_v42 = vld [vmem:[#allocation4 + $0x6b0] sm:$0xff] }
 0x3ed   :  { %2812 = vmatprep.subr.bf16.mxu0 %v4225_v58  ;;  %v1222_v58 = vld [vmem:[#allocation4 + $0x3b0] sm:$0xff] }
 0x3ee   :  { %2852 = vmatpush1.bf16.msra.mxu1 %v4360_v57  ;;  %v1218_v57 = vld [vmem:[#allocation4 + $0x390] sm:$0xff] }
 0x3ef   :  { %2853 = vmatprep.subr.bf16.mxu1 %v4353_v59  ;;  %v1346_v59 = vld [vmem:[#allocation4 + $0x790] sm:$0xff]  ;;  %v4297_v10 = vcombine.high %v1218_v57, %v1222_v58  ;;  %v4296_v16 = vcombine.low %v1218_v57, %v1222_v58 }
 0x3f0   :  { %2813 = vmatpush1.bf16.msra.mxu0 %v4224_v11  ;;  %v4425_v11 = vcombine.high %v1346_v59, %v1350_v60  ;;  %v4424_v17 = vcombine.low %v1346_v59, %v1350_v60  ;;  %v1310_v49 = vld [vmem:[#allocation4 + $0x670] sm:$0xff] }
 0x3f1   :  { %2814 = vmatprep.subr.bf16.mxu0 %v4217_v14  ;;  %v1214_v14 = vld [vmem:[#allocation4 + $0x370] sm:$0xff] }
 0x3f2   :  { %2854 = vmatpush1.bf16.msra.mxu1 %v4352_v12  ;;  %v1210_v12 = vld [vmem:[#allocation4 + $0x350] sm:$0xff] }
 0x3f3   :  { %2855 = vmatprep.subr.bf16.mxu1 %v4345_v15  ;;  %v1338_v15 = vld [vmem:[#allocation4 + $0x750] sm:$0xff]  ;;  %v4289_v61 = vcombine.high %v1210_v12, %v1214_v14  ;;  %v4288_v24 = vcombine.low %v1210_v12, %v1214_v14  ;;  %v1295_v12 = vld [vmem:[#allocation4 + $0x5f8] sm:$0xff] }
 0x3f4   :  { %2815 = vmatpush1.bf16.msra.mxu0 %v4216_v63  ;;  %v4417_v63 = vcombine.high %v1338_v15, %v1342_v3  ;;  %v4416_v25 = vcombine.low %v1338_v15, %v1342_v3  ;;  %v1302_v57 = vld [vmem:[#allocation4 + $0x630] sm:$0xff] }
 0x3f5   :  { %2816 = vmatprep.subr.bf16.mxu0 %v4209_v21  ;;  %v1206_v21 = vld [vmem:[#allocation4 + $0x330] sm:$0xff] }
 0x3f6   :  { %2856 = vmatpush1.bf16.msra.mxu1 %v4344_v20  ;;  %v1202_v20 = vld [vmem:[#allocation4 + $0x310] sm:$0xff] }
 0x3f7   :  { %2857 = vmatprep.subr.bf16.mxu1 %v4337_v22  ;;  %v1330_v22 = vld [vmem:[#allocation4 + $0x710] sm:$0xff]  ;;  %v4281_v30 = vcombine.high %v1202_v20, %v1206_v21  ;;  %v4280_v13 = vcombine.low %v1202_v20, %v1206_v21  ;;  %v1287_v20 = vld [vmem:[#allocation4 + $0x5b8] sm:$0xff] }
 0x3f8   :  { %2817 = vmatpush1.bf16.msra.mxu0 %v4208_v4  ;;  %v4409_v4 = vcombine.high %v1330_v22, %v1334_v23  ;;  %v4408_v8 = vcombine.low %v1330_v22, %v1334_v23 }
 0x3f9   :  { %2818 = vmatprep.subr.bf16.mxu0 %v4201_v53  ;;  %v1198_v53 = vld [vmem:[#allocation4 + $0x2f0] sm:$0xff] }
 0x3fa   :  { %2858 = vmatpush1.bf16.msra.mxu1 %v4336_v27  ;;  %v1194_v27 = vld [vmem:[#allocation4 + $0x2d0] sm:$0xff] }
 0x3fb   :  { %2859 = vmatprep.subr.bf16.mxu1 %v4329_v0  ;;  %v1322_v0 = vld [vmem:[#allocation4 + $0x6d0] sm:$0xff]  ;;  %v4273_v31 = vcombine.high %v1194_v27, %v1198_v53  ;;  %v4272_v43 = vcombine.low %v1194_v27, %v1198_v53  ;;  %v1279_v27 = vld [vmem:[#allocation4 + $0x578] sm:$0xff] }
 0x3fc   :  { %2819 = vmatpush1.bf16.msra.mxu0 %v4200_v36  ;;  %v4401_v36 = vcombine.high %v1322_v0, %v1326_v29  ;;  %v4400_v44 = vcombine.low %v1322_v0, %v1326_v29 }
 0x3fd   :  { %2820 = vmatprep.subr.bf16.mxu0 %v4193_v39  ;;  %v1190_v39 = vld [vmem:[#allocation4 + $0x2b0] sm:$0xff] }
 0x3fe   :  { %2860 = vmatpush1.bf16.msra.mxu1 %v4328_v38  ;;  %v1186_v38 = vld [vmem:[#allocation4 + $0x290] sm:$0xff] }
 0x3ff   :  { %2861 = vmatprep.subr.bf16.mxu1 %v4321_v41  ;;  %v1314_v41 = vld [vmem:[#allocation4 + $0x690] sm:$0xff]  ;;  %v4265_v45 = vcombine.high %v1186_v38, %v1190_v39  ;;  %v4264_v50 = vcombine.low %v1186_v38, %v1190_v39  ;;  %v1271_v38 = vld [vmem:[#allocation4 + $0x538] sm:$0xff] }
 0x400   :  { %2821 = vmatpush1.bf16.msra.mxu0 %v4192_v46  ;;  %v4393_v46 = vcombine.high %v1314_v41, %v1318_v42  ;;  %v4392_v51 = vcombine.low %v1314_v41, %v1318_v42 }
 0x401   :  { %2822 = vmatprep.subr.bf16.mxu0 %v4185_v48  ;;  %v1182_v48 = vld [vmem:[#allocation4 + $0x270] sm:$0xff] }
 0x402   :  { %2862 = vmatpush1.bf16.msra.mxu1 %v4320_v47  ;;  %v1178_v47 = vld [vmem:[#allocation4 + $0x250] sm:$0xff] }
 0x403   :  { %2863 = vmatprep.subr.bf16.mxu1 %v4313_v1  ;;  %v1306_v1 = vld [vmem:[#allocation4 + $0x650] sm:$0xff]  ;;  %v4257_v52 = vcombine.high %v1178_v47, %v1182_v48  ;;  %v4256_v58 = vcombine.low %v1178_v47, %v1182_v48  ;;  %v1263_v47 = vld [vmem:[#allocation4 + $0x4f8] sm:$0xff] }
 0x404   :  { %2823 = vmatpush1.bf16.msra.mxu0 %v4184_v54  ;;  %v4385_v54 = vcombine.high %v1306_v1, %v1310_v49  ;;  %v4384_v59 = vcombine.low %v1306_v1, %v1310_v49  ;;  %v1123_v49 = vld [vmem:[#allocation4 + $0x98] sm:$0xff] }
 0x405   :  { %2824 = vmatprep.subr.bf16.mxu0 %v4305_v40  ;;  %v1174_v40 = vld [vmem:[#allocation4 + $0x230] sm:$0xff] }
 0x406   :  { %2864 = vmatpush1.bf16.msra.mxu1 %v4312_v37  ;;  %v1170_v37 = vld [vmem:[#allocation4 + $0x210] sm:$0xff] }
 0x407   :  { %2865 = vmatprep.subr.bf16.mxu1 %v4433_v56  ;;  %v1298_v56 = vld [vmem:[#allocation4 + $0x610] sm:$0xff]  ;;  %v4249_v60 = vcombine.high %v1170_v37, %v1174_v40  ;;  %v4248_v14 = vcombine.low %v1170_v37, %v1174_v40 }
 0x408   :  { %2825 = vmatpush2.bf16.msra.mxu0 %v4304_v62  ;;  %v4377_v62 = vcombine.high %v1298_v56, %v1302_v57  ;;  %v4376_v15 = vcombine.low %v1298_v56, %v1302_v57  ;;  %v1115_v57 = vld [vmem:[#allocation4 + $0x58] sm:$0xff] }
 0x409   :  { %2826 = vmatprep.subr.bf16.mxu0 %v4297_v10  ;;  %v1167_v10 = vld [vmem:[#allocation4 + $0x1f8] sm:$0xff] }
 0x40a   :  { %2866 = vmatpush2.bf16.msra.mxu1 %v4432_v9  ;;  %v1163_v9 = vld [vmem:[#allocation4 + $0x1d8] sm:$0xff] }
 0x40b   :  { %2867 = vmatprep.subr.bf16.mxu1 %v4425_v11  ;;  %v1291_v11 = vld [vmem:[#allocation4 + $0x5d8] sm:$0xff]  ;;  %v4243_v3 = vcombine.high %v1163_v9, %v1167_v10  ;;  %v4242_v21 = vcombine.low %v1163_v9, %v1167_v10 }
 0x40c   :  { %2827 = vmatpush2.bf16.msra.mxu0 %v4296_v16  ;;  %v4371_v16 = vcombine.high %v1291_v11, %v1295_v12  ;;  %v4370_v22 = vcombine.low %v1291_v11, %v1295_v12  ;;  %v1107_v12 = vld [vmem:[#allocation4 + $0x18] sm:$0xff] }
 0x40d   :  { %2828 = vmatprep.subr.bf16.mxu0 %v4289_v61  ;;  %v1159_v61 = vld [vmem:[#allocation4 + $0x1b8] sm:$0xff] }
 0x40e   :  { %2868 = vmatpush2.bf16.msra.mxu1 %v4424_v17  ;;  %v1155_v17 = vld [vmem:[#allocation4 + $0x198] sm:$0xff] }
 0x40f   :  { %2869 = vmatprep.subr.bf16.mxu1 %v4417_v63  ;;  %v1283_v63 = vld [vmem:[#allocation4 + $0x598] sm:$0xff]  ;;  %v4235_v23 = vcombine.high %v1155_v17, %v1159_v61  ;;  %v4234_v53 = vcombine.low %v1155_v17, %v1159_v61 }
 0x410   :  { %2829 = vmatpush2.bf16.msra.mxu0 %v4288_v24  ;;  %v4363_v24 = vcombine.high %v1283_v63, %v1287_v20  ;;  %v4362_v0 = vcombine.low %v1283_v63, %v1287_v20  ;;  %v1227_v20 = vld [vmem:[#allocation4 + $0x3d8] sm:$0xff] }
 0x411   :  { %2830 = vmatprep.subr.bf16.mxu0 %v4281_v30  ;;  %v1151_v30 = vld [vmem:[#allocation4 + $0x178] sm:$0xff] }
 0x412   :  { %2870 = vmatpush2.bf16.msra.mxu1 %v4416_v25  ;;  %v1147_v25 = vld [vmem:[#allocation4 + $0x158] sm:$0xff] }
 0x413   :  { %2871 = vmatprep.subr.bf16.mxu1 %v4409_v4  ;;  %v1275_v4 = vld [vmem:[#allocation4 + $0x558] sm:$0xff]  ;;  %v4227_v29 = vcombine.high %v1147_v25, %v1151_v30  ;;  %v4226_v39 = vcombine.low %v1147_v25, %v1151_v30 }
 0x414   :  { %2831 = vmatpush2.bf16.msra.mxu0 %v4280_v13  ;;  %v4355_v13 = vcombine.high %v1275_v4, %v1279_v27  ;;  %v4354_v41 = vcombine.low %v1275_v4, %v1279_v27  ;;  %v1219_v27 = vld [vmem:[#allocation4 + $0x398] sm:$0xff] }
 0x415   :  { %2832 = vmatprep.subr.bf16.mxu0 %v4273_v31  ;;  %v1143_v31 = vld [vmem:[#allocation4 + $0x138] sm:$0xff] }
 0x416   :  { %2872 = vmatpush2.bf16.msra.mxu1 %v4408_v8  ;;  %v1139_v8 = vld [vmem:[#allocation4 + $0x118] sm:$0xff] }
 0x417   :  { %2873 = vmatprep.subr.bf16.mxu1 %v4401_v36  ;;  %v1267_v36 = vld [vmem:[#allocation4 + $0x518] sm:$0xff]  ;;  %v4219_v42 = vcombine.high %v1139_v8, %v1143_v31  ;;  %v4218_v48 = vcombine.low %v1139_v8, %v1143_v31 }
 0x418   :  { %2833 = vmatpush2.bf16.msra.mxu0 %v4272_v43  ;;  %v4347_v43 = vcombine.high %v1267_v36, %v1271_v38 }
 0x419   :  { %2834 = vmatprep.subr.bf16.mxu0 %v4265_v45  ;;  %v1135_v45 = vld [vmem:[#allocation4 + $0xf8] sm:$0xff] }
 0x41a   :  { %2874 = vmatpush2.bf16.msra.mxu1 %v4400_v44  ;;  %v1131_v44 = vld [vmem:[#allocation4 + $0xd8] sm:$0xff] }
 0x41b   :  { %2875 = vmatprep.subr.bf16.mxu1 %v4393_v46  ;;  %v1259_v46 = vld [vmem:[#allocation4 + $0x4d8] sm:$0xff]  ;;  %v4211_v1 = vcombine.high %v1131_v44, %v1135_v45 }
 0x41c   :  { %2835 = vmatpush2.bf16.msra.mxu0 %v4264_v50  ;;  %v1127_v50 = vld [vmem:[#allocation4 + $0xb8] sm:$0xff]  ;;  %v4338_v37 = vcombine.low %v1259_v46, %v1263_v47 }
 0x41d   :  { %2836 = vmatprep.subr.bf16.mxu0 %v4257_v52  ;;  %v1255_v52 = vld [vmem:[#allocation4 + $0x4b8] sm:$0xff]  ;;  %v4203_v40 = vcombine.high %v1123_v49, %v1127_v50 }
 0x41e   :  { %2876 = vmatpush2.bf16.msra.mxu1 %v4392_v51  ;;  %v1251_v51 = vld [vmem:[#allocation4 + $0x498] sm:$0xff] }
 0x41f   :  { %2877 = vmatprep.subr.bf16.mxu1 %v4385_v54  ;;  %v4210_v54 = vcombine.low %v1131_v44, %v1135_v45  ;;  %v4331_v56 = vcombine.high %v1251_v51, %v1255_v52  ;;  %v4330_v9 = vcombine.low %v1251_v51, %v1255_v52  ;;  %v1195_v52 = vld [vmem:[#allocation4 + $0x2d8] sm:$0xff] }
 0x420   :  { %2837 = vmatpush2.bf16.msra.mxu0 %v4256_v58  ;;  %v1119_v58 = vld [vmem:[#allocation4 + $0x78] sm:$0xff] }
 0x421   :  { %2838 = vmatprep.subr.bf16.mxu0 %v4249_v60  ;;  %v1247_v60 = vld [vmem:[#allocation4 + $0x478] sm:$0xff]  ;;  %v4195_v10 = vcombine.high %v1115_v57, %v1119_v58 }
 0x422   :  { %2878 = vmatpush2.bf16.msra.mxu1 %v4384_v59  ;;  %v1243_v59 = vld [vmem:[#allocation4 + $0x458] sm:$0xff] }
 0x423   :  { %2879 = vmatprep.subr.bf16.mxu1 %v4377_v62  ;;  %v4202_v62 = vcombine.low %v1123_v49, %v1127_v50  ;;  %v4323_v11 = vcombine.high %v1243_v59, %v1247_v60  ;;  %v4322_v17 = vcombine.low %v1243_v59, %v1247_v60  ;;  %v1187_v60 = vld [vmem:[#allocation4 + $0x298] sm:$0xff] }
 0x424   :  { %2839 = vmatpush2.bf16.msra.mxu0 %v4248_v14  ;;  %v1111_v14 = vld [vmem:[#allocation4 + $0x38] sm:$0xff] }
 0x425   :  { %2890 = vmatprep.subr.bf16.mxu0 %v4243_v3  ;;  %v1239_v3 = vld [vmem:[#allocation4 + $0x438] sm:$0xff]  ;;  %v4187_v61 = vcombine.high %v1107_v12, %v1111_v14 }
 0x426   :  { %2880 = vmatpush2.bf16.msra.mxu1 %v4376_v15  ;;  %v1235_v15 = vld [vmem:[#allocation4 + $0x418] sm:$0xff] }
 0x427   :  { %2931 = vmatprep.subr.bf16.mxu1 %v4371_v16  ;;  %2841 = vmatmul.mubr.bf16.vlgmr.msra.gmra.mxu0 %v5170_v18  ;;  %v4194_v16 = vcombine.low %v1115_v57, %v1119_v58  ;;  %v4315_v63 = vcombine.high %v1235_v15, %v1239_v3  ;;  %v4314_v25 = vcombine.low %v1235_v15, %v1239_v3  ;;  %v1179_v3 = vld [vmem:[#allocation4 + $0x258] sm:$0xff] }
 0x428   :  { %2891 = vmatpush1.bf16.msra.mxu0 %v4242_v21  ;;  %2922 = vmatprep.mubr.bf16.mxu0 %v5162_v32  ;;  %v4346_v32 = vcombine.low %v1267_v36, %v1271_v38  ;;  %v1231_v21 = vld [vmem:[#allocation4 + $0x3f8] sm:$0xff] }
 0x429   :  { %2882 = vmatmul.mubr.bf16.vlgmr.msra.gmra.mxu1 %v5174_v19  ;;  %2892 = vmatprep.subr.bf16.mxu0 %v4235_v23  ;;  %v1359_v23 = vld [vmem:[#allocation4 + $0x7f8] sm:$0xff]  ;;  %v4307_v30 = vcombine.high %v1227_v20, %v1231_v21 }
 0x42a   :  { %2932 = vmatpush1.bf16.msra.mxu1 %v4370_v22  ;;  %2963 = vmatprep.mubr.bf16.mxu1 %v5164_v35  ;;  %v4339_v35 = vcombine.high %v1259_v46, %v1263_v47  ;;  %v1355_v22 = vld [vmem:[#allocation4 + $0x7d8] sm:$0xff] }
 0x42b   :  { %2933 = vmatprep.subr.bf16.mxu1 %v4363_v24  ;;  %v4186_v24 = vcombine.low %v1107_v12, %v1111_v14  ;;  %v4435_v4 = vcombine.high %v1355_v22, %v1359_v23  ;;  %v4434_v8 = vcombine.low %v1355_v22, %v1359_v23  ;;  %v1211_v38 = vld [vmem:[#allocation4 + $0x358] sm:$0xff] }
 0x42c   :  { %2893 = vmatpush1.bf16.msra.mxu0 %v4234_v53  ;;  %v1223_v53 = vld [vmem:[#allocation4 + $0x3b8] sm:$0xff] }
 0x42d   :  { %2894 = vmatprep.subr.bf16.mxu0 %v4227_v29  ;;  %v1351_v29 = vld [vmem:[#allocation4 + $0x7b8] sm:$0xff]  ;;  %v4299_v31 = vcombine.high %v1219_v27, %v1223_v53 }
 0x42e   :  { %2934 = vmatpush1.bf16.msra.mxu1 %v4362_v0  ;;  %v1347_v0 = vld [vmem:[#allocation4 + $0x798] sm:$0xff] }
 0x42f   :  { %2935 = vmatprep.subr.bf16.mxu1 %v4355_v13  ;;  %v4306_v13 = vcombine.low %v1227_v20, %v1231_v21  ;;  %v4427_v36 = vcombine.high %v1347_v0, %v1351_v29  ;;  %v4426_v44 = vcombine.low %v1347_v0, %v1351_v29  ;;  %v1203_v47 = vld [vmem:[#allocation4 + $0x318] sm:$0xff] }
 0x430   :  { %2895 = vmatpush1.bf16.msra.mxu0 %v4226_v39  ;;  %v1215_v39 = vld [vmem:[#allocation4 + $0x378] sm:$0xff] }
 0x431   :  { %2896 = vmatprep.subr.bf16.mxu0 %v4219_v42  ;;  %v1343_v42 = vld [vmem:[#allocation4 + $0x778] sm:$0xff]  ;;  %v4291_v45 = vcombine.high %v1211_v38, %v1215_v39 }
 0x432   :  { %2936 = vmatpush1.bf16.msra.mxu1 %v4354_v41  ;;  %v1339_v41 = vld [vmem:[#allocation4 + $0x758] sm:$0xff] }
 0x433   :  { %2937 = vmatprep.subr.bf16.mxu1 %v4347_v43  ;;  %v4298_v43 = vcombine.low %v1219_v27, %v1223_v53  ;;  %v4419_v46 = vcombine.high %v1339_v41, %v1343_v42  ;;  %v4418_v49 = vcombine.low %v1339_v41, %v1343_v42  ;;  %v1171_v23 = vld [vmem:[#allocation4 + $0x218] sm:$0xff] }
 0x434   :  { %2897 = vmatpush1.bf16.msra.mxu0 %v4218_v48  ;;  %v1207_v48 = vld [vmem:[#allocation4 + $0x338] sm:$0xff] }
 0x435   :  { %2898 = vmatprep.subr.bf16.mxu0 %v4211_v1  ;;  %v1335_v1 = vld [vmem:[#allocation4 + $0x738] sm:$0xff]  ;;  %v4283_v50 = vcombine.high %v1203_v47, %v1207_v48 }
 0x436   :  { %2938 = vmatpush1.bf16.msra.mxu1 %v4346_v32  ;;  %v1331_v32 = vld [vmem:[#allocation4 + $0x718] sm:$0xff] }
 0x437   :  { %2939 = vmatprep.subr.bf16.mxu1 %v4339_v35  ;;  %v4290_v35 = vcombine.low %v1211_v38, %v1215_v39  ;;  %v4411_v51 = vcombine.high %v1331_v32, %v1335_v1  ;;  %v4410_v57 = vcombine.low %v1331_v32, %v1335_v1 }
 0x438   :  { %2899 = vmatpush1.bf16.msra.mxu0 %v4210_v54  ;;  %v1199_v54 = vld [vmem:[#allocation4 + $0x2f8] sm:$0xff] }
 0x439   :  { %2900 = vmatprep.subr.bf16.mxu0 %v4203_v40  ;;  %v1327_v40 = vld [vmem:[#allocation4 + $0x6f8] sm:$0xff]  ;;  %v4275_v58 = vcombine.high %v1195_v52, %v1199_v54 }
 0x43a   :  { %2940 = vmatpush1.bf16.msra.mxu1 %v4338_v37  ;;  %v1323_v37 = vld [vmem:[#allocation4 + $0x6d8] sm:$0xff] }
 0x43b   :  { %2941 = vmatprep.subr.bf16.mxu1 %v4331_v56  ;;  %v4282_v56 = vcombine.low %v1203_v47, %v1207_v48  ;;  %v4403_v59 = vcombine.high %v1323_v37, %v1327_v40  ;;  %v4402_v12 = vcombine.low %v1323_v37, %v1327_v40 }
 0x43c   :  { %2901 = vmatpush1.bf16.msra.mxu0 %v4202_v62  ;;  %v1191_v62 = vld [vmem:[#allocation4 + $0x2b8] sm:$0xff] }
 0x43d   :  { %2902 = vmatprep.subr.bf16.mxu0 %v4195_v10  ;;  %v1319_v10 = vld [vmem:[#allocation4 + $0x6b8] sm:$0xff]  ;;  %v4267_v14 = vcombine.high %v1187_v60, %v1191_v62 }
 0x43e   :  { %2942 = vmatpush1.bf16.msra.mxu1 %v4330_v9  ;;  %v1315_v9 = vld [vmem:[#allocation4 + $0x698] sm:$0xff] }
 0x43f   :  { %2943 = vmatprep.subr.bf16.mxu1 %v4323_v11  ;;  %v4274_v11 = vcombine.low %v1195_v52, %v1199_v54  ;;  %v4395_v15 = vcombine.high %v1315_v9, %v1319_v10  ;;  %v4394_v20 = vcombine.low %v1315_v9, %v1319_v10 }
 0x440   :  { %2903 = vmatpush1.bf16.msra.mxu0 %v4194_v16  ;;  %v1183_v16 = vld [vmem:[#allocation4 + $0x278] sm:$0xff] }
 0x441   :  { %2904 = vmatprep.subr.bf16.mxu0 %v4187_v61  ;;  %v1311_v61 = vld [vmem:[#allocation4 + $0x678] sm:$0xff]  ;;  %v4259_v21 = vcombine.high %v1179_v3, %v1183_v16 }
 0x442   :  { %2944 = vmatpush1.bf16.msra.mxu1 %v4322_v17  ;;  %v1307_v17 = vld [vmem:[#allocation4 + $0x658] sm:$0xff] }
 0x443   :  { %2945 = vmatprep.subr.bf16.mxu1 %v4315_v63  ;;  %v4266_v63 = vcombine.low %v1187_v60, %v1191_v62  ;;  %v4387_v22 = vcombine.high %v1307_v17, %v1311_v61  ;;  %v4386_v27 = vcombine.low %v1307_v17, %v1311_v61 }
 0x444   :  { %2905 = vmatpush1.bf16.msra.mxu0 %v4186_v24  ;;  %v1175_v24 = vld [vmem:[#allocation4 + $0x238] sm:$0xff] }
 0x445   :  { %2906 = vmatprep.subr.bf16.mxu0 %v4307_v30  ;;  %v1303_v30 = vld [vmem:[#allocation4 + $0x638] sm:$0xff]  ;;  %v4251_v53 = vcombine.high %v1171_v23, %v1175_v24  ;;  %v4250_v29 = vcombine.low %v1171_v23, %v1175_v24 }
 0x446   :  { %2946 = vmatpush1.bf16.msra.mxu1 %v4314_v25  ;;  %v1299_v25 = vld [vmem:[#allocation4 + $0x618] sm:$0xff] }
 0x447   :  { %2947 = vmatprep.subr.bf16.mxu1 %v4435_v4  ;;  %v4258_v4 = vcombine.low %v1179_v3, %v1183_v16  ;;  %v4379_v0 = vcombine.high %v1299_v25, %v1303_v30 }
 0x448   :  { %2907 = vmatpush2.bf16.msra.mxu0 %v4306_v13  ;;  %v4378_v13 = vcombine.low %v1299_v25, %v1303_v30 }
 0x449   :  { %2908 = vmatprep.subr.bf16.mxu0 %v4299_v31 }
 0x44a   :  { %2948 = vmatpush2.bf16.msra.mxu1 %v4434_v8 }
 0x44b   :  { %2949 = vmatprep.subr.bf16.mxu1 %v4427_v36 }
 0x44c   :  { %2909 = vmatpush2.bf16.msra.mxu0 %v4298_v43 }
 0x44d   :  { %2910 = vmatprep.subr.bf16.mxu0 %v4291_v45 }
 0x44e   :  { %2950 = vmatpush2.bf16.msra.mxu1 %v4426_v44 }
 0x44f   :  { %2951 = vmatprep.subr.bf16.mxu1 %v4419_v46 }
 0x450   :  { %2911 = vmatpush2.bf16.msra.mxu0 %v4290_v35 }
 0x451   :  { %2912 = vmatprep.subr.bf16.mxu0 %v4283_v50 }
 0x452   :  { %2952 = vmatpush2.bf16.msra.mxu1 %v4418_v49 }
 0x453   :  { %2953 = vmatprep.subr.bf16.mxu1 %v4411_v51 }
 0x454   :  { %2913 = vmatpush2.bf16.msra.mxu0 %v4282_v56 }
 0x455   :  { %2914 = vmatprep.subr.bf16.mxu0 %v4275_v58 }
 0x456   :  { %2954 = vmatpush2.bf16.msra.mxu1 %v4410_v57 }
 0x457   :  { %2955 = vmatprep.subr.bf16.mxu1 %v4403_v59 }
 0x458   :  { %2915 = vmatpush2.bf16.msra.mxu0 %v4274_v11 }
 0x459   :  { %2916 = vmatprep.subr.bf16.mxu0 %v4267_v14 }
 0x45a   :  { %2956 = vmatpush2.bf16.msra.mxu1 %v4402_v12 }
 0x45b   :  { %2957 = vmatprep.subr.bf16.mxu1 %v4395_v15 }
 0x45c   :  { %2917 = vmatpush2.bf16.msra.mxu0 %v4266_v63 }
 0x45d   :  { %2918 = vmatprep.subr.bf16.mxu0 %v4259_v21 }
 0x45e   :  { %2958 = vmatpush2.bf16.msra.mxu1 %v4394_v20 }
 0x45f   :  { %2959 = vmatprep.subr.bf16.mxu1 %v4387_v22 }
 0x460   :  { %2919 = vmatpush2.bf16.msra.mxu0 %v4258_v4 }
 0x461   :  { %2920 = vmatprep.subr.bf16.mxu0 %v4251_v53 }
 0x462   :  { %2960 = vmatpush2.bf16.msra.mxu1 %v4386_v27 }
 0x463   :  { %2961 = vmatprep.subr.bf16.mxu1 %v4379_v0 }
 0x464   :  { %2921 = vmatpush2.bf16.msra.mxu0 %v4250_v29 }
 0x466   :  { %2962 = vmatpush2.bf16.msra.mxu1 %v4378_v13 }
 0x467   :  { %v2678_v8 = vpop.f32.mrf.mxu0  ;;  %2923 = vmatmul.mubr.bf16.vlgmr.msra.gmra.mxu0 %v5170_v18 }
 0x469   :  { %v2719_v31 = vpop.f32.mrf.mxu1  ;;  %2964 = vmatmul.mubr.bf16.vlgmr.msra.gmra.mxu1 %v5174_v19  ;;  %v2680_v38 = vpop.f32.mrf.mxu0 }
 0x46a   :  { %v5190_v36 = vadd.f32 %v2719_v31, %v2678_v8 }
 0x46b   :  { %v2721_v39 = vpop.f32.mrf.mxu1  ;;  %v2682_v44 = vpop.f32.mrf.mxu0 }
 0x46c   :  { %v2972_v41 = vrot.slane %v5190_v36, 4  ;;  %v3028_v42 = vmul.f32 %v5190_v36, %v5190_v36  ;;  %v5195_v43 = vadd.f32 %v2721_v39, %v2680_v38 }
 0x46d   :  { %v2723_v45 = vpop.f32.mrf.mxu1  ;;  %v2683_v48 = vpop.f32.mrf.mxu0 }
 0x46e   :  { %v2973_v46 = vadd.f32 %v2972_v41, %v5190_v36  ;;  %v3036_v47 = vrot.slane %v3028_v42, 4  ;;  %v2978_v18 = vrot.slane %v5195_v43, 4  ;;  %v3029_v19 = vmul.f32 %v5195_v43, %v5195_v43 }
 0x46f   :  { %v2724_v32 = vpop.f32.mrf.mxu1 }
 0x470   :  { %v2974_v1 = vrot.slane %v2973_v46, 2  ;;  %v3037_v35 = vadd.f32 %v3036_v47, %v3028_v42  ;;  %v2979_v49 = vadd.f32 %v2978_v18, %v5195_v43  ;;  %v3042_v50 = vrot.slane %v3029_v19, 4 }
 0x472   :  { %v2975_v51 = vadd.f32 %v2974_v1, %v2973_v46  ;;  %v3038_v52 = vrot.slane %v3037_v35, 2  ;;  %v2980_v54 = vrot.slane %v2979_v49, 2  ;;  %v3043_v37 = vadd.f32 %v3042_v50, %v3029_v19 }
 0x474   :  { %v2976_v40 = vrot.slane %v2975_v51, 1  ;;  %v3039_v56 = vadd.f32 %v3038_v52, %v3037_v35  ;;  %v2981_v57 = vadd.f32 %v2980_v54, %v2979_v49  ;;  %v3044_v58 = vrot.slane %v3043_v37, 2 }
 0x476   :  { %v2977_v59 = vadd.f32 %v2976_v40, %v2975_v51  ;;  %v3040_v60 = vrot.slane %v3039_v56, 1  ;;  %v2982_v62 = vrot.slane %v2981_v57, 1  ;;  %v3045_v9 = vadd.f32 %v3044_v58, %v3043_v37 }
 0x478   :  { %v5202_v10 = vmul.f32 0.125, %v2977_v59  ;;  %v3041_v11 = vadd.f32 %v3040_v60, %v3039_v56  ;;  %v2983_v12 = vadd.f32 %v2982_v62, %v2981_v57  ;;  %v3046_v14 = vrot.slane %v3045_v9, 1 }
 0x47a   :  { %v3084_v15 = vmul.f32 0.125, %v3041_v11  ;;  %v3092_v3 = vmul.f32 %v5202_v10, %v5202_v10  ;;  %v5206_v16 = vmul.f32 0.125, %v2983_v12  ;;  %v3047_v17 = vadd.f32 %v3046_v14, %v3045_v9 }
 0x47c   :  { %v3100_v61 = vsub.f32 %v3084_v15, %v3092_v3  ;;  %v3085_v63 = vmul.f32 0.125, %v3047_v17  ;;  %v3093_v20 = vmul.f32 %v5206_v16, %v5206_v16 }
 0x47e   :  { %v3108_v21 = vmax.f32 %v3100_v61, 0.0  ;;  %v3101_v22 = vsub.f32 %v3085_v63, %v3093_v20 }
 0x480   :  { %v3116_v23 = vadd.f32 0.8, %v3108_v21  ;;  %v3109_v24 = vmax.f32 %v3101_v22, 0.0 }
 0x482   :  { %v3117_v25 = vadd.f32 0.8, %v3109_v24  ;;  %4747 = vrsqrt.f32 %v3116_v23 }
 0x484   :  { %4749 = vrsqrt.f32 %v3117_v25 }
 0x48f   :  { %v4748_v30 = vpop.eup %4747 }
 0x491   :  { %v4750_v4 = vpop.eup %4749 }
 0x492   :  { %v3140_v27 = vcombine.low %v4748_v30, %v4750_v4 }
 0x4a7   :  { %v2760_v53 = vpop.f32.mrf.mxu0 }
 0x4a9   :  { %v2801_v0 = vpop.f32.mrf.mxu1  ;;  %v2762_v13 = vpop.f32.mrf.mxu0 }
 0x4aa   :  { %v5210_v29 = vadd.f32 %v2801_v0, %v2760_v53  ;;  %v5231_v0 = vrot.slane %v3140_v27, %v5084_v28 }
 0x4ab   :  { %v2803_v8 = vpop.f32.mrf.mxu1  ;;  %v2764_v41 = vpop.f32.mrf.mxu0 }
 0x4ac   :  { %v2984_v31 = vrot.slane %v5210_v29, 4  ;;  %v3030_v38 = vmul.f32 %v5210_v29, %v5210_v29  ;;  %v5215_v39 = vadd.f32 %v2803_v8, %v2762_v13 }
 0x4ad   :  { %v2805_v42 = vpop.f32.mrf.mxu1  ;;  %v2765_v18 = vpop.f32.mrf.mxu0 }
 0x4ae   :  { %v2985_v44 = vadd.f32 %v2984_v31, %v5210_v29  ;;  %v3048_v45 = vrot.slane %v3030_v38, 4  ;;  %v2990_v46 = vrot.slane %v5215_v39, 4  ;;  %v3031_v47 = vmul.f32 %v5215_v39, %v5215_v39 }
 0x4af   :  { %v2806_v19 = vpop.f32.mrf.mxu1 }
 0x4b0   :  { %v2986_v48 = vrot.slane %v2985_v44, 2  ;;  %v3049_v32 = vadd.f32 %v3048_v45, %v3030_v38  ;;  %v2991_v1 = vadd.f32 %v2990_v46, %v5215_v39  ;;  %v3054_v35 = vrot.slane %v3031_v47, 4 }
 0x4b2   :  { %v2987_v49 = vadd.f32 %v2986_v48, %v2985_v44  ;;  %v3050_v50 = vrot.slane %v3049_v32, 2  ;;  %v2992_v51 = vrot.slane %v2991_v1, 2  ;;  %v3055_v52 = vadd.f32 %v3054_v35, %v3031_v47 }
 0x4b4   :  { %v2988_v54 = vrot.slane %v2987_v49, 1  ;;  %v3051_v37 = vadd.f32 %v3050_v50, %v3049_v32  ;;  %v2993_v40 = vadd.f32 %v2992_v51, %v2991_v1  ;;  %v3056_v56 = vrot.slane %v3055_v52, 2 }
 0x4b6   :  { %v2989_v57 = vadd.f32 %v2988_v54, %v2987_v49  ;;  %v3052_v58 = vrot.slane %v3051_v37, 1  ;;  %v2994_v59 = vrot.slane %v2993_v40, 1  ;;  %v3057_v60 = vadd.f32 %v3056_v56, %v3055_v52 }
 0x4b8   :  { %v5222_v62 = vmul.f32 0.125, %v2989_v57  ;;  %v3053_v9 = vadd.f32 %v3052_v58, %v3051_v37  ;;  %v2995_v11 = vadd.f32 %v2994_v59, %v2993_v40  ;;  %v3058_v12 = vrot.slane %v3057_v60, 1 }
 0x4ba   :  { %v3086_v14 = vmul.f32 0.125, %v3053_v9  ;;  %v3094_v15 = vmul.f32 %v5222_v62, %v5222_v62  ;;  %v5226_v3 = vmul.f32 0.125, %v2995_v11  ;;  %v3059_v17 = vadd.f32 %v3058_v12, %v3057_v60 }
 0x4bc   :  { %v3102_v61 = vsub.f32 %v3086_v14, %v3094_v15  ;;  %v3087_v63 = vmul.f32 0.125, %v3059_v17  ;;  %v3095_v20 = vmul.f32 %v5226_v3, %v5226_v3 }
 0x4be   :  { %v3110_v21 = vmax.f32 %v3102_v61, 0.0  ;;  %v3103_v22 = vsub.f32 %v3087_v63, %v3095_v20 }
 0x4c0   :  { %v3118_v23 = vadd.f32 0.8, %v3110_v21  ;;  %v3111_v24 = vmax.f32 %v3103_v22, 0.0 }
 0x4c2   :  { %v3119_v25 = vadd.f32 0.8, %v3111_v24  ;;  %4751 = vrsqrt.f32 %v3118_v23 }
 0x4c4   :  { %4753 = vrsqrt.f32 %v3119_v25 }
 0x4cf   :  { %v4752_v30 = vpop.eup %4751 }
 0x4d1   :  { %v4754_v4 = vpop.eup %4753 }
 0x4d2   :  { %v3141_v53 = vcombine.low %v4752_v30, %v4754_v4 }
 0x4d4   :  { %v5234_v13 = vrot.slane %v3141_v53, %v5084_v28 }
 0x4d6   :  { %v3172_v8 = vcombine.low %v5231_v0, %v5234_v13 }
 0x4e7   :  { %v2842_v31 = vpop.f32.mrf.mxu0 }
 0x4e9   :  { %v2883_v38 = vpop.f32.mrf.mxu1  ;;  %v2844_v42 = vpop.f32.mrf.mxu0 }
 0x4ea   :  { %v5238_v41 = vadd.f32 %v2883_v38, %v2842_v31 }
 0x4eb   :  { %v2885_v44 = vpop.f32.mrf.mxu1  ;;  %v2846_v27 = vpop.f32.mrf.mxu0 }
 0x4ec   :  { %v2996_v45 = vrot.slane %v5238_v41, 4  ;;  %v3032_v46 = vmul.f32 %v5238_v41, %v5238_v41  ;;  %v5243_v47 = vadd.f32 %v2885_v44, %v2844_v42 }
 0x4ed   :  { %v2887_v18 = vpop.f32.mrf.mxu1  ;;  %v2847_v35 = vpop.f32.mrf.mxu0 }
 0x4ee   :  { %v2997_v19 = vadd.f32 %v2996_v45, %v5238_v41  ;;  %v3060_v48 = vrot.slane %v3032_v46, 4  ;;  %v3002_v32 = vrot.slane %v5243_v47, 4  ;;  %v3033_v1 = vmul.f32 %v5243_v47, %v5243_v47 }
 0x4ef   :  { %v2888_v49 = vpop.f32.mrf.mxu1 }
 0x4f0   :  { %v2998_v50 = vrot.slane %v2997_v19, 2  ;;  %v3061_v51 = vadd.f32 %v3060_v48, %v3032_v46  ;;  %v3003_v52 = vadd.f32 %v3002_v32, %v5243_v47  ;;  %v3066_v54 = vrot.slane %v3033_v1, 4 }
 0x4f2   :  { %v2999_v37 = vadd.f32 %v2998_v50, %v2997_v19  ;;  %v3062_v40 = vrot.slane %v3061_v51, 2  ;;  %v3004_v56 = vrot.slane %v3003_v52, 2  ;;  %v3067_v57 = vadd.f32 %v3066_v54, %v3033_v1 }
 0x4f4   :  { %v3000_v58 = vrot.slane %v2999_v37, 1  ;;  %v3063_v59 = vadd.f32 %v3062_v40, %v3061_v51  ;;  %v3005_v60 = vadd.f32 %v3004_v56, %v3003_v52  ;;  %v3068_v9 = vrot.slane %v3067_v57, 2 }
 0x4f6   :  { %v3001_v11 = vadd.f32 %v3000_v58, %v2999_v37  ;;  %v3064_v12 = vrot.slane %v3063_v59, 1  ;;  %v3006_v14 = vrot.slane %v3005_v60, 1  ;;  %v3069_v15 = vadd.f32 %v3068_v9, %v3067_v57 }
 0x4f8   :  { %v5250_v17 = vmul.f32 0.125, %v3001_v11  ;;  %v3065_v61 = vadd.f32 %v3064_v12, %v3063_v59  ;;  %v3007_v63 = vadd.f32 %v3006_v14, %v3005_v60  ;;  %v3070_v20 = vrot.slane %v3069_v15, 1 }
 0x4fa   :  { %v3088_v21 = vmul.f32 0.125, %v3065_v61  ;;  %v3096_v22 = vmul.f32 %v5250_v17, %v5250_v17  ;;  %v5254_v23 = vmul.f32 0.125, %v3007_v63  ;;  %v3071_v24 = vadd.f32 %v3070_v20, %v3069_v15 }
 0x4fc   :  { %v3104_v25 = vsub.f32 %v3088_v21, %v3096_v22  ;;  %v3089_v30 = vmul.f32 0.125, %v3071_v24  ;;  %v3097_v4 = vmul.f32 %v5254_v23, %v5254_v23 }
 0x4fe   :  { %v3112_v53 = vmax.f32 %v3104_v25, 0.0  ;;  %v3105_v31 = vsub.f32 %v3089_v30, %v3097_v4 }
 0x500   :  { %v3120_v38 = vadd.f32 0.8, %v3112_v53  ;;  %v3113_v42 = vmax.f32 %v3105_v31, 0.0 }
 0x502   :  { %v3121_v44 = vadd.f32 0.8, %v3113_v42  ;;  %4755 = vrsqrt.f32 %v3120_v38 }
 0x504   :  { %4757 = vrsqrt.f32 %v3121_v44 }
 0x50f   :  { %v4756_v45 = vpop.eup %4755 }
 0x511   :  { %v4758_v46 = vpop.eup %4757 }
 0x512   :  { %v3142_v27 = vcombine.low %v4756_v45, %v4758_v46 }
 0x527   :  { %v2924_v18 = vpop.f32.mrf.mxu0 }
 0x529   :  { %v2965_v19 = vpop.f32.mrf.mxu1  ;;  %v2926_v32 = vpop.f32.mrf.mxu0 }
 0x52a   :  { %v5258_v48 = vadd.f32 %v2965_v19, %v2924_v18 }
 0x52b   :  { %v2967_v1 = vpop.f32.mrf.mxu1  ;;  %v2928_v51 = vpop.f32.mrf.mxu0 }
 0x52c   :  { %v3008_v35 = vrot.slane %v5258_v48, 4  ;;  %v3034_v49 = vmul.f32 %v5258_v48, %v5258_v48  ;;  %v5263_v50 = vadd.f32 %v2967_v1, %v2926_v32 }
 0x52d   :  { %v2969_v52 = vpop.f32.mrf.mxu1  ;;  %v2929_v57 = vpop.f32.mrf.mxu0 }
 0x52e   :  { %v3009_v54 = vadd.f32 %v3008_v35, %v5258_v48  ;;  %v3072_v37 = vrot.slane %v3034_v49, 4  ;;  %v3014_v40 = vrot.slane %v5263_v50, 4  ;;  %v3035_v56 = vmul.f32 %v5263_v50, %v5263_v50 }
 0x52f   :  { %v2970_v58 = vpop.f32.mrf.mxu1  ;;  %v3164_v57 = vrot.slane %v3142_v27, %v5084_v28 }
 0x530   :  { %v3010_v59 = vrot.slane %v3009_v54, 2  ;;  %v3073_v60 = vadd.f32 %v3072_v37, %v3034_v49  ;;  %v3015_v9 = vadd.f32 %v3014_v40, %v5263_v50  ;;  %v3078_v11 = vrot.slane %v3035_v56, 4 }
 0x532   :  { %v3011_v12 = vadd.f32 %v3010_v59, %v3009_v54  ;;  %v3074_v14 = vrot.slane %v3073_v60, 2  ;;  %v3016_v15 = vrot.slane %v3015_v9, 2  ;;  %v3079_v61 = vadd.f32 %v3078_v11, %v3035_v56 }
 0x534   :  { %v3012_v63 = vrot.slane %v3011_v12, 1  ;;  %v3075_v20 = vadd.f32 %v3074_v14, %v3073_v60  ;;  %v3017_v21 = vadd.f32 %v3016_v15, %v3015_v9  ;;  %v3080_v22 = vrot.slane %v3079_v61, 2 }
 0x535   :  { %v3180_v60 = vrot.slane %v3172_v8, %v5084_v28  ;;  %v3214_v14 = vsub.s32 5, %v5081_v26  ;;  %v3218_v15 = vsub.s32 6, %v5081_v26 }
 0x536   :  { %v3013_v24 = vadd.f32 %v3012_v63, %v3011_v12  ;;  %v3076_v25 = vrot.slane %v3075_v20, 1  ;;  %v3018_v30 = vrot.slane %v3017_v21, 1  ;;  %v3081_v4 = vadd.f32 %v3080_v22, %v3079_v61 }
 0x537   :  { %v3210_v12 = vsub.s32 4, %v5081_v26  ;;  %v3222_v61 = vsub.s32 7, %v5081_v26 }
 0x538   :  { %v3026_v53 = vmul.f32 0.125, %v3013_v24  ;;  %v3077_v31 = vadd.f32 %v3076_v25, %v3075_v20  ;;  %v3019_v38 = vadd.f32 %v3018_v30, %v3017_v21  ;;  %v3082_v42 = vrot.slane %v3081_v4, 1 }
 0x53a   :  { %v3090_v44 = vmul.f32 0.125, %v3077_v31  ;;  %v3098_v45 = vmul.f32 %v3026_v53, %v3026_v53  ;;  %v3027_v46 = vmul.f32 0.125, %v3019_v38  ;;  %v3083_v18 = vadd.f32 %v3082_v42, %v3081_v4 }
 0x53c   :  { %v3106_v19 = vsub.f32 %v3090_v44, %v3098_v45  ;;  %v3091_v32 = vmul.f32 0.125, %v3083_v18  ;;  %v3099_v1 = vmul.f32 %v3027_v46, %v3027_v46 }
 0x53e   :  { %v3114_v35 = vmax.f32 %v3106_v19, 0.0  ;;  %v3107_v49 = vsub.f32 %v3091_v32, %v3099_v1 }
 0x540   :  { %v3122_v51 = vadd.f32 0.8, %v3114_v35  ;;  %v3115_v52 = vmax.f32 %v3107_v49, 0.0 }
 0x542   :  { %v3123_v54 = vadd.f32 0.8, %v3115_v52  ;;  %4759 = vrsqrt.f32 %v3122_v51 }
 0x544   :  { %4761 = vrsqrt.f32 %v3123_v54 }
 0x54f   :  { %v4760_v37 = vpop.eup %4759 }
 0x551   :  { %v4762_v40 = vpop.eup %4761 }
 0x552   :  { %v3143_v56 = vcombine.low %v4760_v37, %v4762_v40 }
 0x554   :  { %v3171_v58 = vrot.slane %v3143_v56, %v5084_v28 }
 0x556   :  { %v3173_v59 = vcombine.low %v3164_v57, %v3171_v58 }
 0x558   :  { %v3187_v9 = vrot.slane %v3173_v59, %v5084_v28 }
 0x55a   :  { %v3188_v11 = vcombine.low %v3180_v60, %v3187_v9 }
 0x55c   :  { %v3190_v27 = vmul.f32 %v3188_v11, %v5051_v5 }
 0x55e   :  { %v3195_v63 = vrot.slane %v3190_v27, %v5089_v33  ;;  %v3199_v20 = vrot.slane %v3190_v27, %v5092_v34  ;;  %v3203_v0 = vrot.slane %v3190_v27, %v5136_v55  ;;  %v3207_v13 = vrot.slane %v3190_v27, %v5139_v2 }
 0x55f   :  { %v3211_v8 = vrot.slane %v3190_v27, %v3210_v12  ;;  %v3215_v21 = vrot.slane %v3190_v27, %v3214_v14  ;;  %v3219_v22 = vrot.slane %v3190_v27, %v3218_v15  ;;  %v3223_v24 = vrot.slane %v3190_v27, %v3222_v61 }
 0x560   :  { %v3232_v25 = vmul.f32 %v3195_v63, %v5202_v10  ;;  %v3233_v30 = vmul.f32 %v3199_v20, %v5206_v16  ;;  %v3234_v26 = vmul.f32 %v3203_v0, %v5222_v62  ;;  %v3235_v5 = vmul.f32 %v3207_v13, %v5226_v3 }
 0x561   :  { %v3236_v4 = vmul.f32 %v3211_v8, %v5250_v17  ;;  %v3237_v31 = vmul.f32 %v3215_v21, %v5254_v23  ;;  %v3238_v38 = vmul.f32 %v3219_v22, %v3026_v53  ;;  %v3239_v42 = vmul.f32 %v3223_v24, %v3027_v46 }
 0x562   :  { %v3248_v44 = vcombine.low %v3232_v25, %v3233_v30  ;;  %v3249_v45 = vcombine.low %v3234_v26, %v3235_v5  ;;  %v3299_v18 = vmul.f32 %v3195_v63, %v5190_v36  ;;  %v3300_v19 = vmul.f32 %v3199_v20, %v5195_v43 }
 0x563   :  { %v3250_v32 = vcombine.low %v3236_v4, %v3237_v31  ;;  %v3251_v10 = vcombine.low %v3238_v38, %v3239_v42  ;;  %v3301_v16 = vmul.f32 %v3203_v0, %v5210_v29  ;;  %v3302_v62 = vmul.f32 %v3207_v13, %v5215_v39 }
 0x564   :  { %v3258_v3 = vrot.slane %v3248_v44, %v5084_v28  ;;  %v3265_v17 = vrot.slane %v3249_v45, %v5084_v28  ;;  %v3303_v23 = vmul.f32 %v3211_v8, %v5238_v41  ;;  %v3304_v53 = vmul.f32 %v3215_v21, %v5243_v47 }
 0x565   :  { %v3272_v46 = vrot.slane %v3250_v32, %v5084_v28  ;;  %v3279_v36 = vrot.slane %v3251_v10, %v5084_v28  ;;  %v3305_v43 = vmul.f32 %v3219_v22, %v5258_v48  ;;  %v3306_v1 = vmul.f32 %v3223_v24, %v5263_v50 }
 0x566   :  { %v3280_v35 = vcombine.low %v3258_v3, %v3265_v17 }
 0x567   :  { %v3281_v29 = vcombine.low %v3272_v46, %v3279_v36 }
 0x568   :  { %v3288_v39 = vrot.slane %v3280_v35, %v5084_v28 }
 0x569   :  { %v3295_v49 = vrot.slane %v3281_v29, %v5084_v28 }
 0x56b   :  { %v3296_v51 = vcombine.low %v3288_v39, %v3295_v49 }
 0x56d   :  { %v3298_v52 = vsub.f32 %v5053_v6, %v3296_v51 }
 0x56f   :  { %v3311_v41 = vrot.slane %v3298_v52, %v5089_v33  ;;  %v3315_v47 = vrot.slane %v3298_v52, %v5092_v34  ;;  %v3319_v54 = vrot.slane %v3298_v52, %v5136_v55  ;;  %v3323_v37 = vrot.slane %v3298_v52, %v5139_v2 }
 0x570   :  { %v3327_v48 = vrot.slane %v3298_v52, %v3210_v12  ;;  %v3331_v40 = vrot.slane %v3298_v52, %v3214_v14  ;;  %v3335_v50 = vrot.slane %v3298_v52, %v3218_v15  ;;  %v3339_v56 = vrot.slane %v3298_v52, %v3222_v61 }
 0x571   :  { %v3348_v57 = vadd.f32 %v3311_v41, %v3299_v18  ;;  %v3349_v58 = vadd.f32 %v3315_v47, %v3300_v19  ;;  %v3350_v59 = vadd.f32 %v3319_v54, %v3301_v16  ;;  %v3351_v60 = vadd.f32 %v3323_v37, %v3302_v62 }
 0x572   :  { %v3352_v28 = vadd.f32 %v3327_v48, %v3303_v23  ;;  %v3353_v9 = vadd.f32 %v3331_v40, %v3304_v53  ;;  %v3354_v11 = vadd.f32 %v3335_v50, %v3305_v43  ;;  %v3355_v6 = vadd.f32 %v3339_v56, %v3306_v1 }
 0x573   :  { %v3356_v27 = vmul.f32 0.2, %v3348_v57  ;;  %v3357_v33 = vmul.f32 0.2, %v3349_v58  ;;  %v3358_v63 = vmul.f32 0.2, %v3350_v59 }
 0x574   :  { %v3359_v34 = vmul.f32 0.2, %v3351_v60  ;;  %v3360_v20 = vmul.f32 0.2, %v3352_v28  ;;  %v3361_v55 = vmul.f32 0.2, %v3353_v9 }
 0x575   :  { %v3362_v0 = vmul.f32 0.2, %v3354_v11  ;;  %v3363_v2 = vmul.f32 0.2, %v3355_v6  ;;  %v5311_v12 = vmax.f32 %v3348_v57, %v3356_v27  ;;  %v3365_v14 = vmax.f32 %v3349_v58, %v3357_v33 }
 0x576   :  { %v5313_v15 = vmax.f32 %v3350_v59, %v3358_v63  ;;  %v3367_v61 = vmax.f32 %v3351_v60, %v3359_v34  ;;  %v5315_v13 = vmax.f32 %v3352_v28, %v3360_v20  ;;  %v5317_v8 = vmax.f32 %v3353_v9, %v3361_v55 }
 0x577   :  { %v5319_v21 = vmax.f32 %v3354_v11, %v3362_v0  ;;  %v5321_v22 = vmax.f32 %v3355_v6, %v3363_v2 }
 0x578   :  { %4979 = dma.done.wait [#allocation6 + $0x3], 8192 }
 0x579   :  { %4980 = vsyncadd [#allocation6 + $0x3], 4294959104  ;;  %v3505_v24 = vpack.c.bf16 %v3365_v14, %v3365_v14  ;;  %v3507_v25 = vpack.c.bf16 %v3367_v61, %v3367_v61  ;;  %v4763_v30 = vld [vmem:[#allocation5 + $0x78] sm:$0xff]   ;;  %v4767_v31 = vld [vmem:[#allocation5 + $0x70] sm:$0xff]   ;;  %v3504_v37 = vpack.c.bf16 %v5311_v12, %v5311_v12  ;;  %v3506_v48 = vpack.c.bf16 %v5313_v15, %v5313_v15 }
 0x57a   :  { %v4764_v26 = vld [vmem:[#allocation5 + $0xf8] sm:$0xff]   ;;  %4507 = vmatprep.subr.bf16.mxu0 %v4763_v30  ;;  %v4768_v38 = vld [vmem:[#allocation5 + $0xf0] sm:$0xff]   ;;  %v4771_v45 = vld [vmem:[#allocation5 + $0x68] sm:$0xff]   ;;  %v3509_v56 = vpack.c.bf16 %v5317_v8, %v5317_v8  ;;  %v3511_v58 = vpack.c.bf16 %v5321_v22, %v5321_v22 }
 0x57b   :  { %3934 = vmatprep.mubr.bf16.mxu0 %v3505_v24  ;;  %3974 = vmatprep.mubr.bf16.mxu1 %v3507_v25  ;;  %v4765_v5 = vld [vmem:[#allocation5 + $0x38] sm:$0xff]   ;;  %v4769_v42 = vld [vmem:[#allocation5 + $0x30] sm:$0xff]   ;;  %v4772_v18 = vld [vmem:[#allocation5 + $0xe8] sm:$0xff]  }
 0x57c   :  { %4529 = vmatprep.subr.bf16.mxu1 %v4764_v26  ;;  %v4766_v4 = vld [vmem:[#allocation5 + $0xb8] sm:$0xff]   ;;  %4508 = vmatpush3.bf16.msra.mxu0 %v4765_v5  ;;  %v4770_v44 = vld [vmem:[#allocation5 + $0xb0] sm:$0xff]   ;;  %v4773_v19 = vld [vmem:[#allocation5 + $0x28] sm:$0xff]  }
 0x57d   :  { %4530 = vmatpush3.bf16.msra.mxu1 %v4766_v4  ;;  %4509 = vmatprep.subr.bf16.mxu0 %v4767_v31  ;;  %v4774_v32 = vld [vmem:[#allocation5 + $0xa8] sm:$0xff]   ;;  %v4775_v10 = vld [vmem:[#allocation5 + $0x60] sm:$0xff]   ;;  %v4779_v17 = vld [vmem:[#allocation5 + $0x58] sm:$0xff]  }
 0x57e   :  { %4531 = vmatprep.subr.bf16.mxu1 %v4768_v38  ;;  %v4776_v16 = vld [vmem:[#allocation5 + $0xe0] sm:$0xff]   ;;  %v4780_v23 = vld [vmem:[#allocation5 + $0xd8] sm:$0xff]   ;;  %v4783_v36 = vld [vmem:[#allocation5 + $0x50] sm:$0xff]  }
 0x57f   :  { %v4777_v62 = vld [vmem:[#allocation5 + $0x20] sm:$0xff]   ;;  %v4781_v53 = vld [vmem:[#allocation5 + $0x18] sm:$0xff]   ;;  %v4784_v43 = vld [vmem:[#allocation5 + $0xd0] sm:$0xff]  }
 0x580   :  { %4510 = vmatpush3.bf16.msra.mxu0 %v4769_v42  ;;  %v4778_v3 = vld [vmem:[#allocation5 + $0xa0] sm:$0xff]   ;;  %v4782_v46 = vld [vmem:[#allocation5 + $0x98] sm:$0xff]   ;;  %v4785_v1 = vld [vmem:[#allocation5 + $0x10] sm:$0xff]  }
 0x581   :  { %4532 = vmatpush3.bf16.msra.mxu1 %v4770_v44  ;;  %4511 = vmatprep.subr.bf16.mxu0 %v4771_v45  ;;  %v4786_v35 = vld [vmem:[#allocation5 + $0x90] sm:$0xff]   ;;  %v4787_v29 = vld [vmem:[#allocation5 + $0x48] sm:$0xff]   ;;  %v4791_v52 = vld [vmem:[#allocation5 + $0x40] sm:$0xff]   ;;  %v3508_v44 = vpack.c.bf16 %v5315_v13, %v5315_v13  ;;  %v3510_v45 = vpack.c.bf16 %v5319_v21, %v5319_v21 }
 0x582   :  { %4533 = vmatprep.subr.bf16.mxu1 %v4772_v18  ;;  %v4788_v39 = vld [vmem:[#allocation5 + $0xc8] sm:$0xff]   ;;  %v4792_v41 = vld [vmem:[#allocation5 + $0xc0] sm:$0xff]   ;;  %v4795_v40 = vld [vmem:[#allocation5 + $0x178] sm:$0xff]  }
 0x583   :  { %v4789_v49 = vld [vmem:[#allocation5 + $0x8] sm:$0xff]   ;;  %v4793_v47 = vld [vmem:[#allocation5] sm:$0xff]   ;;  %v4796_v50 = vld [vmem:[#allocation5 + $0x1f8] sm:$0xff]  }
 0x584   :  { %4512 = vmatpush3.bf16.msra.mxu0 %v4773_v19  ;;  %v4790_v51 = vld [vmem:[#allocation5 + $0x88] sm:$0xff]   ;;  %v4794_v54 = vld [vmem:[#allocation5 + $0x80] sm:$0xff]   ;;  %v4797_v57 = vld [vmem:[#allocation5 + $0x138] sm:$0xff]  }
 0x585   :  { %4534 = vmatpush3.bf16.msra.mxu1 %v4774_v32  ;;  %4513 = vmatprep.subr.bf16.mxu0 %v4775_v10  ;;  %v4798_v59 = vld [vmem:[#allocation5 + $0x1b8] sm:$0xff]   ;;  %v4799_v60 = vld [vmem:[#allocation5 + $0x170] sm:$0xff]   ;;  %v4803_v6 = vld [vmem:[#allocation5 + $0x168] sm:$0xff]  }
 0x586   :  { %4535 = vmatprep.subr.bf16.mxu1 %v4776_v16  ;;  %v4800_v28 = vld [vmem:[#allocation5 + $0x1f0] sm:$0xff]   ;;  %v4804_v27 = vld [vmem:[#allocation5 + $0x1e8] sm:$0xff]   ;;  %v4807_v34 = vld [vmem:[#allocation5 + $0x160] sm:$0xff]  }
 0x587   :  { %v4801_v9 = vld [vmem:[#allocation5 + $0x130] sm:$0xff]   ;;  %v4805_v33 = vld [vmem:[#allocation5 + $0x128] sm:$0xff]   ;;  %v4808_v20 = vld [vmem:[#allocation5 + $0x1e0] sm:$0xff]  }
 0x588   :  { %4514 = vmatpush3.bf16.msra.mxu0 %v4777_v62  ;;  %v4802_v11 = vld [vmem:[#allocation5 + $0x1b0] sm:$0xff]   ;;  %v4806_v63 = vld [vmem:[#allocation5 + $0x1a8] sm:$0xff]   ;;  %v4809_v55 = vld [vmem:[#allocation5 + $0x120] sm:$0xff]  }
 0x589   :  { %4536 = vmatpush3.bf16.msra.mxu1 %v4778_v3  ;;  %4515 = vmatprep.subr.bf16.mxu0 %v4779_v17  ;;  %v4810_v0 = vld [vmem:[#allocation5 + $0x1a0] sm:$0xff]   ;;  %v4811_v2 = vld [vmem:[#allocation5 + $0x158] sm:$0xff]   ;;  %v4815_v61 = vld [vmem:[#allocation5 + $0x150] sm:$0xff]  }
 0x58a   :  { %4537 = vmatprep.subr.bf16.mxu1 %v4780_v23  ;;  %v4812_v12 = vld [vmem:[#allocation5 + $0x1d8] sm:$0xff]   ;;  %v4816_v8 = vld [vmem:[#allocation5 + $0x1d0] sm:$0xff]   ;;  %v4819_v25 = vld [vmem:[#allocation5 + $0x148] sm:$0xff]  }
 0x58b   :  { %v4813_v14 = vld [vmem:[#allocation5 + $0x118] sm:$0xff]   ;;  %v4817_v22 = vld [vmem:[#allocation5 + $0x110] sm:$0xff]   ;;  %v4820_v30 = vld [vmem:[#allocation5 + $0x1c8] sm:$0xff]  }
 0x58c   :  { %4516 = vmatpush3.bf16.msra.mxu0 %v4781_v53  ;;  %v4814_v15 = vld [vmem:[#allocation5 + $0x198] sm:$0xff]   ;;  %v4818_v24 = vld [vmem:[#allocation5 + $0x190] sm:$0xff]   ;;  %v4821_v26 = vld [vmem:[#allocation5 + $0x108] sm:$0xff]  }
 0x58d   :  { %4538 = vmatpush3.bf16.msra.mxu1 %v4782_v46  ;;  %4517 = vmatprep.subr.bf16.mxu0 %v4783_v36  ;;  %v4822_v5 = vld [vmem:[#allocation5 + $0x188] sm:$0xff]   ;;  %v4823_v4 = vld [vmem:[#allocation5 + $0x140] sm:$0xff]  }
 0x58e   :  { %4539 = vmatprep.subr.bf16.mxu1 %v4784_v43  ;;  %v4824_v31 = vld [vmem:[#allocation5 + $0x1c0] sm:$0xff]  }
 0x58f   :  { %v4825_v38 = vld [vmem:[#allocation5 + $0x100] sm:$0xff]  }
 0x590   :  { %4518 = vmatpush3.bf16.msra.mxu0 %v4785_v1  ;;  %v4826_v42 = vld [vmem:[#allocation5 + $0x180] sm:$0xff]  }
 0x591   :  { %4540 = vmatpush3.bf16.msra.mxu1 %v4786_v35  ;;  %4519 = vmatprep.subr.bf16.mxu0 %v4787_v29 }
 0x592   :  { %4541 = vmatprep.subr.bf16.mxu1 %v4788_v39 }
 0x594   :  { %4520 = vmatpush3.bf16.msra.mxu0 %v4789_v49 }
 0x595   :  { %4542 = vmatpush3.bf16.msra.mxu1 %v4790_v51  ;;  %4521 = vmatprep.subr.bf16.mxu0 %v4791_v52 }
 0x596   :  { %4543 = vmatprep.subr.bf16.mxu1 %v4792_v41 }
 0x598   :  { %4522 = vmatpush3.bf16.msra.mxu0 %v4793_v47 }
 0x599   :  { %4544 = vmatpush3.bf16.msra.mxu1 %v4794_v54  ;;  %4551 = vmatprep.subr.bf16.mxu0 %v4795_v40 }
 0x59a   :  { %4573 = vmatprep.subr.bf16.mxu1 %v4796_v50 }
 0x59b   :  { %3935 = vmatmul.mubr.bf16.vlgmr.msra.gmra.mxu0 %v3504_v37 }
 0x59c   :  { %3975 = vmatmul.mubr.bf16.vlgmr.msra.gmra.mxu1 %v3506_v48  ;;  %4552 = vmatpush3.bf16.msra.mxu0 %v4797_v57 }
 0x59d   :  { %4574 = vmatpush3.bf16.msra.mxu1 %v4798_v59  ;;  %4014 = vmatprep.mubr.bf16.mxu0 %v3509_v56 }
 0x59e   :  { %4553 = vmatprep.subr.bf16.mxu0 %v4799_v60  ;;  %4054 = vmatprep.mubr.bf16.mxu1 %v3511_v58 }
 0x59f   :  { %4575 = vmatprep.subr.bf16.mxu1 %v4800_v28 }
 0x5a0   :  { %4554 = vmatpush3.bf16.msra.mxu0 %v4801_v9 }
 0x5a1   :  { %4576 = vmatpush3.bf16.msra.mxu1 %v4802_v11  ;;  %4555 = vmatprep.subr.bf16.mxu0 %v4803_v6 }
 0x5a2   :  { %4577 = vmatprep.subr.bf16.mxu1 %v4804_v27 }
 0x5a4   :  { %4556 = vmatpush3.bf16.msra.mxu0 %v4805_v33 }
 0x5a5   :  { %4578 = vmatpush3.bf16.msra.mxu1 %v4806_v63  ;;  %4557 = vmatprep.subr.bf16.mxu0 %v4807_v34 }
 0x5a6   :  { %4579 = vmatprep.subr.bf16.mxu1 %v4808_v20 }
 0x5a8   :  { %4558 = vmatpush3.bf16.msra.mxu0 %v4809_v55 }
 0x5a9   :  { %4580 = vmatpush3.bf16.msra.mxu1 %v4810_v0  ;;  %4559 = vmatprep.subr.bf16.mxu0 %v4811_v2 }
 0x5aa   :  { %4581 = vmatprep.subr.bf16.mxu1 %v4812_v12 }
 0x5ac   :  { %4560 = vmatpush3.bf16.msra.mxu0 %v4813_v14 }
 0x5ad   :  { %4582 = vmatpush3.bf16.msra.mxu1 %v4814_v15  ;;  %4561 = vmatprep.subr.bf16.mxu0 %v4815_v61 }
 0x5ae   :  { %4583 = vmatprep.subr.bf16.mxu1 %v4816_v8 }
 0x5b0   :  { %4562 = vmatpush3.bf16.msra.mxu0 %v4817_v22 }
 0x5b1   :  { %4584 = vmatpush3.bf16.msra.mxu1 %v4818_v24  ;;  %4563 = vmatprep.subr.bf16.mxu0 %v4819_v25 }
 0x5b2   :  { %4585 = vmatprep.subr.bf16.mxu1 %v4820_v30 }
 0x5b4   :  { %4564 = vmatpush3.bf16.msra.mxu0 %v4821_v26 }
 0x5b5   :  { %4586 = vmatpush3.bf16.msra.mxu1 %v4822_v5  ;;  %4565 = vmatprep.subr.bf16.mxu0 %v4823_v4 }
 0x5b6   :  { %4587 = vmatprep.subr.bf16.mxu1 %v4824_v31 }
 0x5b8   :  { %4566 = vmatpush3.bf16.msra.mxu0 %v4825_v38 }
 0x5b9   :  { %4588 = vmatpush3.bf16.msra.mxu1 %v4826_v42 }
 0x5bb   :  { %4015 = vmatmul.mubr.bf16.vlgmr.msra.gmra.mxu0 %v3508_v44 }
 0x5bc   :  { %4055 = vmatmul.mubr.bf16.vlgmr.msra.gmra.mxu1 %v3510_v45 }
 0x65b   :  { %v4523_v18 = vpop.f32.mrf.mxu0 }
 0x65c   :  { %v4545_v19 = vpop.f32.mrf.mxu1 }
 0x65d   :  { %v4524_v32 = vpop.f32.mrf.mxu0 }
 0x65e   :  { %v4546_v10 = vpop.f32.mrf.mxu1  ;;  %v4525_v23 = vadd.f32 %v4524_v32, %v4523_v18 }
 0x65f   :  { %v4526_v16 = vpop.f32.mrf.mxu0  ;;  %v4547_v46 = vadd.f32 %v4546_v10, %v4545_v19 }
 0x660   :  { %v4548_v62 = vpop.f32.mrf.mxu1  ;;  %v3937_v53 = vadd.f32 %v4525_v23, %v5055_v7 }
 0x661   :  { %v4527_v3 = vpop.f32.mrf.mxu0 }
 0x662   :  { %v4549_v17 = vpop.f32.mrf.mxu1  ;;  %v3977_v1 = vadd.f32 %v4547_v46, %v3937_v53 }
 0x67b   :  { %v4567_v13 = vpop.f32.mrf.mxu0 }
 0x67c   :  { %v4589_v36 = vpop.f32.mrf.mxu1 }
 0x67d   :  { %v4568_v43 = vpop.f32.mrf.mxu0 }
 0x67e   :  { %v4569_v21 = vadd.f32 %v4568_v43, %v4567_v13  ;;  %v4590_v35 = vpop.f32.mrf.mxu1 }
 0x67f   :  { %v4570_v29 = vpop.f32.mrf.mxu0  ;;  %v4591_v49 = vadd.f32 %v4590_v35, %v4589_v36 }
 0x680   :  { %v4017_v39 = vadd.f32 %v4569_v21, %v3977_v1  ;;  %v4592_v51 = vpop.f32.mrf.mxu1 }
 0x681   :  { %v4571_v52 = vpop.f32.mrf.mxu0 }
 0x682   :  { %v4057_v41 = vadd.f32 %v4591_v49, %v4017_v39  ;;  %v4593_v47 = vpop.f32.mrf.mxu1 }
 0x684   :  { %4827 = vtanh.f32 %v4057_v41 }
 0x691   :  { %v4828_v54 = vpop.eup %4827 }
 0x692   :  { %4063 = vst [vmem:[%s5346_s7] sm:$0xff] %v4828_v54 }
 0x693   :  { %4068 = vsyncpa [#allocation8], 1 }
 0x694   :  { %4069 = vsyncpa [#allocation10], 1 }
 0x695   :  { %4070 = vsyncmov [#allocation6] }
 0x698   :  { %s4071_s10 = vpop.sfrf %4070 }
 0x699   :  { %p4501_p7 = scmp.ne.s32.totalorder %s4071_s10, 0 }
 0x69b   :  { %4075 = shalt.err (%p4501_p7)  }
 0x69c   :  { %4077 = vsyncmov [#allocation6 + $0x1] }
 0x69f   :  { %s4078_s11 = vpop.sfrf %4077 }
 0x6a0   :  { %p4502_p8 = scmp.ne.s32.totalorder %s4078_s11, 0 }
 0x6a2   :  { %4082 = shalt.err (%p4502_p8)  }
 0x6a3   :  { %4084 = vsyncmov [#allocation6 + $0x2] }
 0x6a6   :  { %s4085_s12 = vpop.sfrf %4084 }
 0x6a7   :  { %p4503_p9 = scmp.ne.s32.totalorder %s4085_s12, 0 }
 0x6a9   :  { %4089 = shalt.err (%p4503_p9)  }
 0x6aa   :  { %4091 = vsyncmov [#allocation6 + $0x3] }
 0x6ad   :  { %s4092_s13 = vpop.sfrf %4091 }
 0x6ae   :  { %p4504_p10 = scmp.ne.s32.totalorder %s4092_s13, 0 }
 0x6b0   :  { %4096 = shalt.err (%p4504_p10)  }

</bundles_post_ra>
